<compile_context>
chip_gen: v7x
topology: tpu7x:2x2x1
jax: 0.10.0
libtpu: 0.0.40
codegen_flags: <defaults>
</compile_context>

<pallas_src>
import functools

import jax
import jax.numpy as jnp
from jax.experimental import pallas as pl
from jax.experimental.pallas import tpu as pltpu

# ----------------------------- small BERT config ------------------------------
VOCAB = 100
H = 32              # hidden_size
N_LAYERS = 2
N_HEADS = 2
D_HEAD = H // N_HEADS
FF = 64             # intermediate size
MAX_POS = 16
PE_HIDDEN = 128     # prob_embed hidden width
B = 2               # batch
S = 8               # sequence length
BERT_LN_EPS = 1e-12
DEF_LN_EPS = 1e-5
MASK_BIAS = -10000.0


def _ln(x, g, b, eps):
    """LayerNorm over the last (lane) dim — f32 math."""
    mu = jnp.mean(x, axis=-1, keepdims=True)
    var = jnp.mean((x - mu) ** 2, axis=-1, keepdims=True)
    return (x - mu) * jax.lax.rsqrt(var + eps) * g + b


# --------------------------- single fused kernel -------------------------------
def _fused_forward_kernel(*refs, batch, seq, n_layers, n_heads, d_head, use_logprobs):
    f32 = jnp.float32

    # ---- unpack refs (inputs..., out_ref) ----
    out_ref = refs[-1]
    it = iter(refs[:-1])
    word_e_ref = next(it)      # (B*S, H)  gathered word embeddings
    pos_e_ref = next(it)       # (S, H)
    type_e_ref = next(it)      # (1, H)
    emb_g_ref = next(it)       # (1, H)
    emb_b_ref = next(it)       # (1, H)
    if use_logprobs:
        lp_ref = next(it)      # (B*S, 1)  raw token logprobs
        pe_w1_ref = next(it)   # (1, 128)
        pe_b1_ref = next(it)   # (1, 128)
        pe_g_ref = next(it)    # (1, 128)
        pe_be_ref = next(it)   # (1, 128)
        pe_w2_ref = next(it)   # (128, H)
        pe_b2_ref = next(it)   # (1, H)
    bias2d_ref = next(it)      # (B*S, B*S) block-diagonal additive attention bias
    sel_ref = next(it)         # (B, B*S)   one-hot CLS-row selector
    layer_refs = [tuple(next(it) for _ in range(12)) for _ in range(n_layers)]
    pool_w_ref = next(it)      # (H, H)
    pool_b_ref = next(it)      # (1, H)
    cl_w1_ref = next(it)       # (H, H//2)
    cl_b1_ref = next(it)       # (1, H//2)
    cl_g_ref = next(it)        # (1, H//2)
    cl_be_ref = next(it)       # (1, H//2)
    cl_w2_ref = next(it)       # (H//2, 1)
    cl_b2_ref = next(it)       # (1, 1)

    # ---- BERT embeddings: word + position + token-type, LayerNorm ----
    pos = pos_e_ref[...]                                   # (S, H)
    pos_full = jnp.concatenate([pos] * batch, axis=0)      # (B*S, H), sublane-aligned concat
    x = word_e_ref[...] + pos_full + type_e_ref[...]
    x = _ln(x, emb_g_ref[...], emb_b_ref[...], BERT_LN_EPS)

    # ---- MyEmbed: clamp + per-sequence standardize + prob_embed MLP, added AFTER LN ----
    if use_logprobs:
        lp = jnp.clip(lp_ref[...], -20.0, 0.0)             # (B*S, 1)
        segs = []
        for bi in range(batch):                            # per-sequence stats (torch.std ddof=1)
            seg = lp[bi * seq:(bi + 1) * seq, :]            # (S, 1), sublane-aligned slice
            mu = jnp.mean(seg, axis=0, keepdims=True)
            var = jnp.sum((seg - mu) ** 2, axis=0, keepdims=True) / (seq - 1)
            sig = jnp.sqrt(var) + 1e-6
            segs.append((seg - mu) / sig)
        norm_col = jnp.concatenate(segs, axis=0)            # (B*S, 1)
        h = norm_col * pe_w1_ref[...] + pe_b1_ref[...]      # Linear(1,128) as broadcast multiply
        h = _ln(h, pe_g_ref[...], pe_be_ref[...], DEF_LN_EPS)
        h = h * jax.nn.sigmoid(h)                           # SiLU
        extra = jnp.dot(h, pe_w2_ref[...], preferred_element_type=f32) + pe_b2_ref[...]
        x = x + extra

    # ---- attention bias, hoisted once (reused by every layer/head) ----
    bias2d = bias2d_ref[...]                                # (B*S, B*S)
    scale = 1.0 / (d_head ** 0.5)

    # ---- transformer encoder layers (Python-unrolled; everything stays in VMEM/vregs) ----
    for (wqkv_ref, bqkv_ref, wo_ref, bo_ref, ln1_g_ref, ln1_b_ref,
         wi_ref, bi_ref, wf_ref, bf_ref, ln2_g_ref, ln2_b_ref) in layer_refs:
        attn = None
        for hi in range(n_heads):
            # Per-head projections over ALL tokens; per-head weights indexed on an
            # untiled leading axis, so no unaligned lane slicing anywhere.
            q_h = jnp.dot(x, wqkv_ref[hi], preferred_element_type=f32) + bqkv_ref[hi]
            k_h = jnp.dot(x, wqkv_ref[n_heads + hi], preferred_element_type=f32) + bqkv_ref[n_heads + hi]
            v_h = jnp.dot(x, wqkv_ref[2 * n_heads + hi], preferred_element_type=f32) + bqkv_ref[2 * n_heads + hi]
            # One score / one context matmul for the whole (B*S) block; the block-diagonal
            # -10000 bias makes cross-batch weights underflow to exactly 0 after exp().
            sc = jax.lax.dot_general(q_h, k_h, (((1,), (1,)), ((), ())),
                                     preferred_element_type=f32) * scale + bias2d
            sc = sc - jnp.max(sc, axis=-1, keepdims=True)
            pr = jnp.exp(sc)
            # softmax denominator on the EUP (approx reciprocal) instead of a VALU divide
            pr = pr * pl.reciprocal(jnp.sum(pr, axis=-1, keepdims=True), approx=True)
            ctx = jnp.dot(pr, v_h, preferred_element_type=f32)               # (B*S, d_head)
            contrib = jnp.dot(ctx, wo_ref[hi], preferred_element_type=f32)   # (B*S, H)
            attn = contrib if attn is None else attn + contrib
        attn_out = attn + bo_ref[...]                                        # (B*S, H)
        x = _ln(attn_out + x, ln1_g_ref[...], ln1_b_ref[...], BERT_LN_EPS)
        # TODO(synk): HF BERT uses exact erf-GELU; tanh-approx GELU is used for Mosaic-safe lowering.
        ff = jax.nn.gelu(jnp.dot(x, wi_ref[...], preferred_element_type=f32) + bi_ref[...],
                         approximate=True)
        ff = jnp.dot(ff, wf_ref[...], preferred_element_type=f32) + bf_ref[...]
        x = _ln(ff + x, ln2_g_ref[...], ln2_b_ref[...], BERT_LN_EPS)

    # ---- pooler (tanh on CLS tokens) + classifier, batched (dropout = identity) ----
    cls = jnp.dot(sel_ref[...], x, preferred_element_type=f32)               # (B, H) CLS gather via MXU
    pooled = jnp.tanh(jnp.dot(cls, pool_w_ref[...], preferred_element_type=f32) + pool_b_ref[...])
    hc = jnp.dot(pooled, cl_w1_ref[...], preferred_element_type=f32) + cl_b1_ref[...]
    hc = _ln(hc, cl_g_ref[...], cl_be_ref[...], DEF_LN_EPS)
    hc = jnp.maximum(hc, 0.0)
    logit = jnp.dot(hc, cl_w2_ref[...], preferred_element_type=f32) + cl_b2_ref[...]   # (B, 1)
    out_ref[...] = logit


# ------------------------------- parameters -----------------------------------
def init_params(key):
    keys = iter(jax.random.split(key, 64))

    def nrm(shape, scale=0.02):
        return jax.random.normal(next(keys), shape, jnp.float32) * scale

    p = {
        "word_emb": nrm((VOCAB, H)),
        "pos_emb": nrm((MAX_POS, H)),
        "type_emb": nrm((2, H)),
        "emb_ln_g": jnp.ones((1, H)), "emb_ln_b": jnp.zeros((1, H)),
        # MyEmbed.prob_embed : Linear(1,128) -> LayerNorm(128) -> SiLU -> Linear(128, H)
        "pe_w1": nrm((1, PE_HIDDEN)), "pe_b1": jnp.zeros((1, PE_HIDDEN)),
        "pe_ln_g": jnp.ones((1, PE_HIDDEN)), "pe_ln_b": jnp.zeros((1, PE_HIDDEN)),
        "pe_w2": nrm((PE_HIDDEN, H)), "pe_b2": jnp.zeros((1, H)),
        # pooler
        "pool_w": nrm((H, H)), "pool_b": jnp.zeros((1, H)),
        # classifier : Linear(H, H//2) -> LayerNorm -> ReLU -> Dropout -> Linear(H//2, 1)
        "cl_w1": nrm((H, H // 2)), "cl_b1": jnp.zeros((1, H // 2)),
        "cl_ln_g": jnp.ones((1, H // 2)), "cl_ln_b": jnp.zeros((1, H // 2)),
        "cl_w2": nrm((H // 2, 1)), "cl_b2": jnp.zeros((1, 1)),
    }
    # NOTE: global_feat_proj params are omitted — in the reference forward its output only
    # feeds `combined`, which is never used (classifier consumes only the pooled output).
    layers = []
    for _ in range(N_LAYERS):
        layers.append(dict(
            # Per-head Q/K/V weights stacked on a leading (untiled) axis:
            #   index h -> Q head h ; N_HEADS + h -> K head h ; 2*N_HEADS + h -> V head h
            wqkv=nrm((3 * N_HEADS, H, D_HEAD)),
            bqkv=jnp.zeros((3 * N_HEADS, 1, D_HEAD)),
            # Output projection split by head along its input dim: sum_h ctx_h @ wo[h] == ctx @ Wo.
            wo=nrm((N_HEADS, D_HEAD, H)), bo=jnp.zeros((1, H)),
            ln1_g=jnp.ones((1, H)), ln1_b=jnp.zeros((1, H)),
            wi=nrm((H, FF)), bi=jnp.zeros((1, FF)),
            wf=nrm((FF, H)), bf=jnp.zeros((1, H)),
            ln2_g=jnp.ones((1, H)), ln2_b=jnp.zeros((1, H)),
        ))
    p["layers"] = layers
    return p


# ------------------------------- forward pass ----------------------------------
def hallucination_detector_forward(p, input_ids, attention_mask,
                                   token_logprobs=None, global_features=None):
    b, s = input_ids.shape
    n_tok = b * s
    assert s >= 2, "per-sequence std uses ddof=1; need seq_len >= 2"
    use_logprobs = token_logprobs is not None

    # Wrapper-side glue: embedding-table gather + tiny mask/selector construction.
    # Everything else runs inside ONE fused Pallas kernel (no per-op pallas_calls, no grid).
    # TODO(synk): at real bert-base scale keep word_emb HBM-resident (memory_space=pl.ANY +
    # DMA gather) and stream per-layer weights; the all-VMEM-resident plan only fits toy shapes.
    word_e = p["word_emb"][input_ids].reshape(n_tok, H)
    pos_e = p["pos_emb"][:s]
    type_e = p["type_emb"][0:1]

    # Block-diagonal additive attention bias over the flattened (B*S) token block:
    # HF-style -10000 on masked keys within a batch, -10000 on every cross-batch key column.
    # exp() of these entries underflows to exactly 0 in f32, so attention over the full block
    # is numerically identical to independent per-sequence attention.
    mask_bias = (1.0 - attention_mask.astype(jnp.float32)) * MASK_BIAS           # (B, S)
    same_batch = jnp.eye(b, dtype=jnp.float32)                                    # (B, B)
    key_bias = jnp.where(same_batch[:, :, None] > 0.0,
                         mask_bias[None, :, :], MASK_BIAS)                         # (B, B, S)
    bias2d = jnp.broadcast_to(key_bias.reshape(b, 1, n_tok),
                              (b, s, n_tok)).reshape(n_tok, n_tok)                 # (B*S, B*S)

    # One-hot selector of each sequence's CLS row -> gathered with one tiny MXU matmul.
    cls_sel = (jnp.arange(n_tok)[None, :] ==
               (jnp.arange(b) * s)[:, None]).astype(jnp.float32)                   # (B, B*S)

    inputs = [word_e, pos_e, type_e, p["emb_ln_g"], p["emb_ln_b"]]
    if use_logprobs:
        lp_col = token_logprobs.astype(jnp.float32).reshape(n_tok, 1)
        inputs += [lp_col, p["pe_w1"], p["pe_b1"], p["pe_ln_g"], p["pe_ln_b"],
                   p["pe_w2"], p["pe_b2"]]
    inputs += [bias2d, cls_sel]
    for lyr in p["layers"]:
        inputs += [lyr["wqkv"], lyr["bqkv"], lyr["wo"], lyr["bo"],
                   lyr["ln1_g"], lyr["ln1_b"], lyr["wi"], lyr["bi"],
                   lyr["wf"], lyr["bf"], lyr["ln2_g"], lyr["ln2_b"]]
    inputs += [p["pool_w"], p["pool_b"], p["cl_w1"], p["cl_b1"],
               p["cl_ln_g"], p["cl_ln_b"], p["cl_w2"], p["cl_b2"]]

    kernel = functools.partial(
        _fused_forward_kernel, batch=b, seq=s, n_layers=len(p["layers"]),
        n_heads=N_HEADS, d_head=D_HEAD, use_logprobs=use_logprobs)

    # global_feat_proj is dead code in the reference forward (its result is unused) -> dropped.
    logits = pl.pallas_call(
        kernel,
        out_shape=jax.ShapeDtypeStruct((b, 1), jnp.float32),
        compiler_params=pltpu.CompilerParams(vmem_limit_bytes=32 * 1024 * 1024),
    )(*inputs)
    return logits.reshape(b)


# ----------------------------------- main --------------------------------------
if __name__ == "__main__":
    key = jax.random.PRNGKey(0)
    k_param, k_ids, k_lp, k_gf = jax.random.split(key, 4)

    params = init_params(k_param)

    input_ids = jax.random.randint(k_ids, (B, S), 0, VOCAB, dtype=jnp.int32)
    attention_mask = jnp.ones((B, S), jnp.int32)
    token_logprobs = -5.0 * jax.random.uniform(k_lp, (B, S), jnp.float32)
    global_features = jax.random.normal(k_gf, (B, 4), jnp.float32)

    fwd = jax.jit(hallucination_detector_forward)
    out = fwd(params, input_ids, attention_mask, token_logprobs, global_features)
    jax.block_until_ready(out)
    assert out.shape == (B,)
    print("KERNEL_OK")
</pallas_src>

<mosaic_0001>
module attributes {stable_mosaic.version = 11 : i64} {
  func.func @_fused_forward_kernel(%arg0: memref<16x32xf32, #tpu.memory_space<vmem>>, %arg1: memref<8x32xf32, #tpu.memory_space<vmem>>, %arg2: memref<1x32xf32, #tpu.memory_space<vmem>>, %arg3: memref<1x32xf32, #tpu.memory_space<vmem>>, %arg4: memref<1x32xf32, #tpu.memory_space<vmem>>, %arg5: memref<16x1xf32, #tpu.memory_space<vmem>>, %arg6: memref<1x128xf32, #tpu.memory_space<vmem>>, %arg7: memref<1x128xf32, #tpu.memory_space<vmem>>, %arg8: memref<1x128xf32, #tpu.memory_space<vmem>>, %arg9: memref<1x128xf32, #tpu.memory_space<vmem>>, %arg10: memref<128x32xf32, #tpu.memory_space<vmem>>, %arg11: memref<1x32xf32, #tpu.memory_space<vmem>>, %arg12: memref<16x16xf32, #tpu.memory_space<vmem>>, %arg13: memref<2x16xf32, #tpu.memory_space<vmem>>, %arg14: memref<6x32x16xf32, #tpu.memory_space<vmem>>, %arg15: memref<6x1x16xf32, #tpu.memory_space<vmem>>, %arg16: memref<2x16x32xf32, #tpu.memory_space<vmem>>, %arg17: memref<1x32xf32, #tpu.memory_space<vmem>>, %arg18: memref<1x32xf32, #tpu.memory_space<vmem>>, %arg19: memref<1x32xf32, #tpu.memory_space<vmem>>, %arg20: memref<32x64xf32, #tpu.memory_space<vmem>>, %arg21: memref<1x64xf32, #tpu.memory_space<vmem>>, %arg22: memref<64x32xf32, #tpu.memory_space<vmem>>, %arg23: memref<1x32xf32, #tpu.memory_space<vmem>>, %arg24: memref<1x32xf32, #tpu.memory_space<vmem>>, %arg25: memref<1x32xf32, #tpu.memory_space<vmem>>, %arg26: memref<6x32x16xf32, #tpu.memory_space<vmem>>, %arg27: memref<6x1x16xf32, #tpu.memory_space<vmem>>, %arg28: memref<2x16x32xf32, #tpu.memory_space<vmem>>, %arg29: memref<1x32xf32, #tpu.memory_space<vmem>>, %arg30: memref<1x32xf32, #tpu.memory_space<vmem>>, %arg31: memref<1x32xf32, #tpu.memory_space<vmem>>, %arg32: memref<32x64xf32, #tpu.memory_space<vmem>>, %arg33: memref<1x64xf32, #tpu.memory_space<vmem>>, %arg34: memref<64x32xf32, #tpu.memory_space<vmem>>, %arg35: memref<1x32xf32, #tpu.memory_space<vmem>>, %arg36: memref<1x32xf32, #tpu.memory_space<vmem>>, %arg37: memref<1x32xf32, #tpu.memory_space<vmem>>, %arg38: memref<32x32xf32, #tpu.memory_space<vmem>>, %arg39: memref<1x32xf32, #tpu.memory_space<vmem>>, %arg40: memref<32x16xf32, #tpu.memory_space<vmem>>, %arg41: memref<1x16xf32, #tpu.memory_space<vmem>>, %arg42: memref<1x16xf32, #tpu.memory_space<vmem>>, %arg43: memref<1x16xf32, #tpu.memory_space<vmem>>, %arg44: memref<16x1xf32, #tpu.memory_space<vmem>>, %arg45: memref<1x1xf32, #tpu.memory_space<vmem>>, %arg46: memref<2x1xf32, #tpu.memory_space<vmem>>) attributes {dimension_semantics = [], scalar_prefetch = 0 : i64, scratch_operands = 0 : i64, tpu.core_type = #tpu.core_type<tc>} {
    %c0 = arith.constant 0 : index
    %c0_0 = arith.constant 0 : index
    %0 = vector.load %arg1[%c0, %c0_0] : memref<8x32xf32, #tpu.memory_space<vmem>>, vector<8x32xf32>
    %1 = tpu.concatenate %0, %0 in 0 : vector<8x32xf32>, vector<8x32xf32> -> vector<16x32xf32>
    %c0_1 = arith.constant 0 : index
    %c0_2 = arith.constant 0 : index
    %2 = vector.load %arg0[%c0_1, %c0_2] : memref<16x32xf32, #tpu.memory_space<vmem>>, vector<16x32xf32>
    %3 = arith.addf %2, %1 : vector<16x32xf32>
    %c0_3 = arith.constant 0 : index
    %c0_4 = arith.constant 0 : index
    %4 = vector.load %arg2[%c0_3, %c0_4] : memref<1x32xf32, #tpu.memory_space<vmem>>, vector<1x32xf32>
    %5 = vector.broadcast %4 : vector<1x32xf32> to vector<16x32xf32>
    %6 = arith.addf %3, %5 : vector<16x32xf32>
    %c0_5 = arith.constant 0 : index
    %c0_6 = arith.constant 0 : index
    %7 = vector.load %arg3[%c0_5, %c0_6] : memref<1x32xf32, #tpu.memory_space<vmem>>, vector<1x32xf32>
    %c0_7 = arith.constant 0 : index
    %c0_8 = arith.constant 0 : index
    %8 = vector.load %arg4[%c0_7, %c0_8] : memref<1x32xf32, #tpu.memory_space<vmem>>, vector<1x32xf32>
    %cst = arith.constant dense<0.000000e+00> : vector<16xf32>
    %9 = vector.multi_reduction <add>, %6, %cst [1] : vector<16x32xf32> to vector<16xf32>
    %10 = vector.shape_cast %9 : vector<16xf32> to vector<16x1xf32>
    %cst_9 = arith.constant 3.200000e+01 : f32
    %11 = vector.broadcast %cst_9 : f32 to vector<16x1xf32>
    %12 = arith.divf %10, %11 : vector<16x1xf32>
    %13 = vector.broadcast %12 : vector<16x1xf32> to vector<16x32xf32>
    %14 = arith.subf %6, %13 : vector<16x32xf32>
    %15 = arith.mulf %14, %14 : vector<16x32xf32>
    %cst_10 = arith.constant dense<0.000000e+00> : vector<16xf32>
    %16 = vector.multi_reduction <add>, %15, %cst_10 [1] : vector<16x32xf32> to vector<16xf32>
    %17 = vector.shape_cast %16 : vector<16xf32> to vector<16x1xf32>
    %cst_11 = arith.constant 3.200000e+01 : f32
    %18 = vector.broadcast %cst_11 : f32 to vector<16x1xf32>
    %19 = arith.divf %17, %18 : vector<16x1xf32>
    %20 = vector.broadcast %12 : vector<16x1xf32> to vector<16x32xf32>
    %21 = arith.subf %6, %20 : vector<16x32xf32>
    %cst_12 = arith.constant 9.99999996E-13 : f32
    %22 = vector.broadcast %cst_12 : f32 to vector<16x1xf32>
    %23 = arith.addf %19, %22 : vector<16x1xf32>
    %24 = math.rsqrt %23 : vector<16x1xf32>
    %25 = vector.broadcast %24 : vector<16x1xf32> to vector<16x32xf32>
    %26 = arith.mulf %21, %25 : vector<16x32xf32>
    %27 = vector.broadcast %7 : vector<1x32xf32> to vector<16x32xf32>
    %28 = arith.mulf %26, %27 : vector<16x32xf32>
    %29 = vector.broadcast %8 : vector<1x32xf32> to vector<16x32xf32>
    %30 = arith.addf %28, %29 : vector<16x32xf32>
    %c0_13 = arith.constant 0 : index
    %c0_14 = arith.constant 0 : index
    %31 = vector.load %arg5[%c0_13, %c0_14] : memref<16x1xf32, #tpu.memory_space<vmem>>, vector<16x1xf32>
    %cst_15 = arith.constant -2.000000e+01 : f32
    %cst_16 = arith.constant 0.000000e+00 : f32
    %32 = vector.broadcast %cst_15 : f32 to vector<16x1xf32>
    %33 = arith.maximumf %32, %31 : vector<16x1xf32>
    %34 = vector.broadcast %cst_16 : f32 to vector<16x1xf32>
    %35 = arith.minimumf %34, %33 : vector<16x1xf32>
    %36 = vector.extract_strided_slice %35 {offsets = [0, 0], sizes = [8, 1], strides = [1, 1]} : vector<16x1xf32> to vector<8x1xf32>
    %cst_17 = arith.constant dense<0.000000e+00> : vector<1xf32>
    %37 = vector.multi_reduction <add>, %36, %cst_17 [0] : vector<8x1xf32> to vector<1xf32>
    %38 = vector.shape_cast %37 : vector<1xf32> to vector<1x1xf32>
    %cst_18 = arith.constant 8.000000e+00 : f32
    %39 = vector.broadcast %cst_18 : f32 to vector<1x1xf32>
    %40 = arith.divf %38, %39 : vector<1x1xf32>
    %41 = vector.broadcast %40 : vector<1x1xf32> to vector<8x1xf32>
    %42 = arith.subf %36, %41 : vector<8x1xf32>
    %43 = arith.mulf %42, %42 : vector<8x1xf32>
    %cst_19 = arith.constant dense<0.000000e+00> : vector<1xf32>
    %44 = vector.multi_reduction <add>, %43, %cst_19 [0] : vector<8x1xf32> to vector<1xf32>
    %45 = vector.shape_cast %44 : vector<1xf32> to vector<1x1xf32>
    %cst_20 = arith.constant 7.000000e+00 : f32
    %46 = vector.broadcast %cst_20 : f32 to vector<1x1xf32>
    %47 = arith.divf %45, %46 : vector<1x1xf32>
    %48 = math.sqrt %47 : vector<1x1xf32>
    %cst_21 = arith.constant 9.99999997E-7 : f32
    %49 = vector.broadcast %cst_21 : f32 to vector<1x1xf32>
    %50 = arith.addf %48, %49 : vector<1x1xf32>
    %51 = vector.broadcast %40 : vector<1x1xf32> to vector<8x1xf32>
    %52 = arith.subf %36, %51 : vector<8x1xf32>
    %53 = vector.broadcast %50 : vector<1x1xf32> to vector<8x1xf32>
    %54 = arith.divf %52, %53 : vector<8x1xf32>
    %55 = vector.extract_strided_slice %35 {offsets = [8, 0], sizes = [8, 1], strides = [1, 1]} : vector<16x1xf32> to vector<8x1xf32>
    %cst_22 = arith.constant dense<0.000000e+00> : vector<1xf32>
    %56 = vector.multi_reduction <add>, %55, %cst_22 [0] : vector<8x1xf32> to vector<1xf32>
    %57 = vector.shape_cast %56 : vector<1xf32> to vector<1x1xf32>
    %cst_23 = arith.constant 8.000000e+00 : f32
    %58 = vector.broadcast %cst_23 : f32 to vector<1x1xf32>
    %59 = arith.divf %57, %58 : vector<1x1xf32>
    %60 = vector.broadcast %59 : vector<1x1xf32> to vector<8x1xf32>
    %61 = arith.subf %55, %60 : vector<8x1xf32>
    %62 = arith.mulf %61, %61 : vector<8x1xf32>
    %cst_24 = arith.constant dense<0.000000e+00> : vector<1xf32>
    %63 = vector.multi_reduction <add>, %62, %cst_24 [0] : vector<8x1xf32> to vector<1xf32>
    %64 = vector.shape_cast %63 : vector<1xf32> to vector<1x1xf32>
    %cst_25 = arith.constant 7.000000e+00 : f32
    %65 = vector.broadcast %cst_25 : f32 to vector<1x1xf32>
    %66 = arith.divf %64, %65 : vector<1x1xf32>
    %67 = math.sqrt %66 : vector<1x1xf32>
    %cst_26 = arith.constant 9.99999997E-7 : f32
    %68 = vector.broadcast %cst_26 : f32 to vector<1x1xf32>
    %69 = arith.addf %67, %68 : vector<1x1xf32>
    %70 = vector.broadcast %59 : vector<1x1xf32> to vector<8x1xf32>
    %71 = arith.subf %55, %70 : vector<8x1xf32>
    %72 = vector.broadcast %69 : vector<1x1xf32> to vector<8x1xf32>
    %73 = arith.divf %71, %72 : vector<8x1xf32>
    %74 = tpu.concatenate %54, %73 in 0 : vector<8x1xf32>, vector<8x1xf32> -> vector<16x1xf32>
    %c0_27 = arith.constant 0 : index
    %c0_28 = arith.constant 0 : index
    %75 = vector.load %arg6[%c0_27, %c0_28] : memref<1x128xf32, #tpu.memory_space<vmem>>, vector<1x128xf32>
    %76 = vector.broadcast %74 : vector<16x1xf32> to vector<16x128xf32>
    %77 = vector.broadcast %75 : vector<1x128xf32> to vector<16x128xf32>
    %78 = arith.mulf %76, %77 : vector<16x128xf32>
    %c0_29 = arith.constant 0 : index
    %c0_30 = arith.constant 0 : index
    %79 = vector.load %arg7[%c0_29, %c0_30] : memref<1x128xf32, #tpu.memory_space<vmem>>, vector<1x128xf32>
    %80 = vector.broadcast %79 : vector<1x128xf32> to vector<16x128xf32>
    %81 = arith.addf %78, %80 : vector<16x128xf32>
    %c0_31 = arith.constant 0 : index
    %c0_32 = arith.constant 0 : index
    %82 = vector.load %arg8[%c0_31, %c0_32] : memref<1x128xf32, #tpu.memory_space<vmem>>, vector<1x128xf32>
    %c0_33 = arith.constant 0 : index
    %c0_34 = arith.constant 0 : index
    %83 = vector.load %arg9[%c0_33, %c0_34] : memref<1x128xf32, #tpu.memory_space<vmem>>, vector<1x128xf32>
    %cst_35 = arith.constant dense<0.000000e+00> : vector<16xf32>
    %84 = vector.multi_reduction <add>, %81, %cst_35 [1] : vector<16x128xf32> to vector<16xf32>
    %85 = vector.shape_cast %84 : vector<16xf32> to vector<16x1xf32>
    %cst_36 = arith.constant 1.280000e+02 : f32
    %86 = vector.broadcast %cst_36 : f32 to vector<16x1xf32>
    %87 = arith.divf %85, %86 : vector<16x1xf32>
    %88 = vector.broadcast %87 : vector<16x1xf32> to vector<16x128xf32>
    %89 = arith.subf %81, %88 : vector<16x128xf32>
    %90 = arith.mulf %89, %89 : vector<16x128xf32>
    %cst_37 = arith.constant dense<0.000000e+00> : vector<16xf32>
    %91 = vector.multi_reduction <add>, %90, %cst_37 [1] : vector<16x128xf32> to vector<16xf32>
    %92 = vector.shape_cast %91 : vector<16xf32> to vector<16x1xf32>
    %cst_38 = arith.constant 1.280000e+02 : f32
    %93 = vector.broadcast %cst_38 : f32 to vector<16x1xf32>
    %94 = arith.divf %92, %93 : vector<16x1xf32>
    %95 = vector.broadcast %87 : vector<16x1xf32> to vector<16x128xf32>
    %96 = arith.subf %81, %95 : vector<16x128xf32>
    %cst_39 = arith.constant 9.99999974E-6 : f32
    %97 = vector.broadcast %cst_39 : f32 to vector<16x1xf32>
    %98 = arith.addf %94, %97 : vector<16x1xf32>
    %99 = math.rsqrt %98 : vector<16x1xf32>
    %100 = vector.broadcast %99 : vector<16x1xf32> to vector<16x128xf32>
    %101 = arith.mulf %96, %100 : vector<16x128xf32>
    %102 = vector.broadcast %82 : vector<1x128xf32> to vector<16x128xf32>
    %103 = arith.mulf %101, %102 : vector<16x128xf32>
    %104 = vector.broadcast %83 : vector<1x128xf32> to vector<16x128xf32>
    %105 = arith.addf %103, %104 : vector<16x128xf32>
    %106 = arith.negf %105 : vector<16x128xf32>
    %107 = math.exp %106 : vector<16x128xf32>
    %cst_40 = arith.constant 1.000000e+00 : f32
    %108 = vector.broadcast %cst_40 : f32 to vector<16x128xf32>
    %109 = arith.addf %108, %107 : vector<16x128xf32>
    %110 = arith.divf %108, %109 : vector<16x128xf32>
    %111 = arith.mulf %105, %110 : vector<16x128xf32>
    %c0_41 = arith.constant 0 : index
    %c0_42 = arith.constant 0 : index
    %112 = vector.load %arg10[%c0_41, %c0_42] : memref<128x32xf32, #tpu.memory_space<vmem>>, vector<128x32xf32>
    %cst_43 = arith.constant dense<0.000000e+00> : vector<16x32xf32>
    %113 = tpu.matmul %111, %112, %cst_43 {dimension_numbers = #tpu.dot_dimension_numbers<[1], [0], [0], [1], [0, 0, 1, 1], [], []>} : vector<16x128xf32>, vector<128x32xf32>, vector<16x32xf32> -> vector<16x32xf32>
    %c0_44 = arith.constant 0 : index
    %c0_45 = arith.constant 0 : index
    %114 = vector.load %arg11[%c0_44, %c0_45] : memref<1x32xf32, #tpu.memory_space<vmem>>, vector<1x32xf32>
    %115 = vector.broadcast %114 : vector<1x32xf32> to vector<16x32xf32>
    %116 = arith.addf %113, %115 : vector<16x32xf32>
    %117 = arith.addf %30, %116 : vector<16x32xf32>
    %c0_46 = arith.constant 0 : index
    %c0_47 = arith.constant 0 : index
    %118 = vector.load %arg12[%c0_46, %c0_47] : memref<16x16xf32, #tpu.memory_space<vmem>>, vector<16x16xf32>
    %c0_48 = arith.constant 0 : index
    %c0_49 = arith.constant 0 : index
    %c0_50 = arith.constant 0 : index
    %119 = vector.load %arg14[%c0_48, %c0_49, %c0_50] : memref<6x32x16xf32, #tpu.memory_space<vmem>>, vector<1x32x16xf32>
    %120 = vector.shape_cast %119 : vector<1x32x16xf32> to vector<32x16xf32>
    %cst_51 = arith.constant dense<0.000000e+00> : vector<16x16xf32>
    %121 = tpu.matmul %117, %120, %cst_51 {dimension_numbers = #tpu.dot_dimension_numbers<[1], [0], [0], [1], [0, 0, 1, 1], [], []>} : vector<16x32xf32>, vector<32x16xf32>, vector<16x16xf32> -> vector<16x16xf32>
    %c0_52 = arith.constant 0 : index
    %c0_53 = arith.constant 0 : index
    %c0_54 = arith.constant 0 : index
    %122 = vector.load %arg15[%c0_52, %c0_53, %c0_54] : memref<6x1x16xf32, #tpu.memory_space<vmem>>, vector<1x1x16xf32>
    %123 = vector.shape_cast %122 : vector<1x1x16xf32> to vector<1x16xf32>
    %124 = vector.broadcast %123 : vector<1x16xf32> to vector<16x16xf32>
    %125 = arith.addf %121, %124 : vector<16x16xf32>
    %c2 = arith.constant 2 : index
    %c0_55 = arith.constant 0 : index
    %c0_56 = arith.constant 0 : index
    %126 = vector.load %arg14[%c2, %c0_55, %c0_56] : memref<6x32x16xf32, #tpu.memory_space<vmem>>, vector<1x32x16xf32>
    %127 = vector.shape_cast %126 : vector<1x32x16xf32> to vector<32x16xf32>
    %cst_57 = arith.constant dense<0.000000e+00> : vector<16x16xf32>
    %128 = tpu.matmul %117, %127, %cst_57 {dimension_numbers = #tpu.dot_dimension_numbers<[1], [0], [0], [1], [0, 0, 1, 1], [], []>} : vector<16x32xf32>, vector<32x16xf32>, vector<16x16xf32> -> vector<16x16xf32>
    %c2_58 = arith.constant 2 : index
    %c0_59 = arith.constant 0 : index
    %c0_60 = arith.constant 0 : index
    %129 = vector.load %arg15[%c2_58, %c0_59, %c0_60] : memref<6x1x16xf32, #tpu.memory_space<vmem>>, vector<1x1x16xf32>
    %130 = vector.shape_cast %129 : vector<1x1x16xf32> to vector<1x16xf32>
    %131 = vector.broadcast %130 : vector<1x16xf32> to vector<16x16xf32>
    %132 = arith.addf %128, %131 : vector<16x16xf32>
    %c4 = arith.constant 4 : index
    %c0_61 = arith.constant 0 : index
    %c0_62 = arith.constant 0 : index
    %133 = vector.load %arg14[%c4, %c0_61, %c0_62] : memref<6x32x16xf32, #tpu.memory_space<vmem>>, vector<1x32x16xf32>
    %134 = vector.shape_cast %133 : vector<1x32x16xf32> to vector<32x16xf32>
    %cst_63 = arith.constant dense<0.000000e+00> : vector<16x16xf32>
    %135 = tpu.matmul %117, %134, %cst_63 {dimension_numbers = #tpu.dot_dimension_numbers<[1], [0], [0], [1], [0, 0, 1, 1], [], []>} : vector<16x32xf32>, vector<32x16xf32>, vector<16x16xf32> -> vector<16x16xf32>
    %c4_64 = arith.constant 4 : index
    %c0_65 = arith.constant 0 : index
    %c0_66 = arith.constant 0 : index
    %136 = vector.load %arg15[%c4_64, %c0_65, %c0_66] : memref<6x1x16xf32, #tpu.memory_space<vmem>>, vector<1x1x16xf32>
    %137 = vector.shape_cast %136 : vector<1x1x16xf32> to vector<1x16xf32>
    %138 = vector.broadcast %137 : vector<1x16xf32> to vector<16x16xf32>
    %139 = arith.addf %135, %138 : vector<16x16xf32>
    %cst_67 = arith.constant dense<0.000000e+00> : vector<16x16xf32>
    %140 = tpu.matmul %125, %132, %cst_67 {dimension_numbers = #tpu.dot_dimension_numbers<[1], [1], [0], [0], [0, 0, 1, 0], [], []>} : vector<16x16xf32>, vector<16x16xf32>, vector<16x16xf32> -> vector<16x16xf32>
    %cst_68 = arith.constant 2.500000e-01 : f32
    %141 = vector.broadcast %cst_68 : f32 to vector<16x16xf32>
    %142 = arith.mulf %140, %141 : vector<16x16xf32>
    %143 = arith.addf %142, %118 : vector<16x16xf32>
    %cst_69 = arith.constant dense<0xFF800000> : vector<16xf32>
    %144 = vector.multi_reduction <maximumf>, %143, %cst_69 [1] : vector<16x16xf32> to vector<16xf32>
    %145 = vector.shape_cast %144 : vector<16xf32> to vector<16x1xf32>
    %146 = vector.broadcast %145 : vector<16x1xf32> to vector<16x16xf32>
    %147 = arith.subf %143, %146 : vector<16x16xf32>
    %148 = math.exp %147 : vector<16x16xf32>
    %cst_70 = arith.constant dense<0.000000e+00> : vector<16xf32>
    %149 = vector.multi_reduction <add>, %148, %cst_70 [1] : vector<16x16xf32> to vector<16xf32>
    %150 = vector.shape_cast %149 : vector<16xf32> to vector<16x1xf32>
    %151 = tpu.reciprocal %150 {approx = true} : vector<16x1xf32> -> vector<16x1xf32>
    %152 = vector.broadcast %151 : vector<16x1xf32> to vector<16x16xf32>
    %153 = arith.mulf %148, %152 : vector<16x16xf32>
    %cst_71 = arith.constant dense<0.000000e+00> : vector<16x16xf32>
    %154 = tpu.matmul %153, %139, %cst_71 {dimension_numbers = #tpu.dot_dimension_numbers<[1], [0], [0], [1], [0, 0, 1, 1], [], []>} : vector<16x16xf32>, vector<16x16xf32>, vector<16x16xf32> -> vector<16x16xf32>
    %c0_72 = arith.constant 0 : index
    %c0_73 = arith.constant 0 : index
    %c0_74 = arith.constant 0 : index
    %155 = vector.load %arg16[%c0_72, %c0_73, %c0_74] : memref<2x16x32xf32, #tpu.memory_space<vmem>>, vector<1x16x32xf32>
    %156 = vector.shape_cast %155 : vector<1x16x32xf32> to vector<16x32xf32>
    %cst_75 = arith.constant dense<0.000000e+00> : vector<16x32xf32>
    %157 = tpu.matmul %154, %156, %cst_75 {dimension_numbers = #tpu.dot_dimension_numbers<[1], [0], [0], [1], [0, 0, 1, 1], [], []>} : vector<16x16xf32>, vector<16x32xf32>, vector<16x32xf32> -> vector<16x32xf32>
    %c1 = arith.constant 1 : index
    %c0_76 = arith.constant 0 : index
    %c0_77 = arith.constant 0 : index
    %158 = vector.load %arg14[%c1, %c0_76, %c0_77] : memref<6x32x16xf32, #tpu.memory_space<vmem>>, vector<1x32x16xf32>
    %159 = vector.shape_cast %158 : vector<1x32x16xf32> to vector<32x16xf32>
    %cst_78 = arith.constant dense<0.000000e+00> : vector<16x16xf32>
    %160 = tpu.matmul %117, %159, %cst_78 {dimension_numbers = #tpu.dot_dimension_numbers<[1], [0], [0], [1], [0, 0, 1, 1], [], []>} : vector<16x32xf32>, vector<32x16xf32>, vector<16x16xf32> -> vector<16x16xf32>
    %c1_79 = arith.constant 1 : index
    %c0_80 = arith.constant 0 : index
    %c0_81 = arith.constant 0 : index
    %161 = vector.load %arg15[%c1_79, %c0_80, %c0_81] : memref<6x1x16xf32, #tpu.memory_space<vmem>>, vector<1x1x16xf32>
    %162 = vector.shape_cast %161 : vector<1x1x16xf32> to vector<1x16xf32>
    %163 = vector.broadcast %162 : vector<1x16xf32> to vector<16x16xf32>
    %164 = arith.addf %160, %163 : vector<16x16xf32>
    %c3 = arith.constant 3 : index
    %c0_82 = arith.constant 0 : index
    %c0_83 = arith.constant 0 : index
    %165 = vector.load %arg14[%c3, %c0_82, %c0_83] : memref<6x32x16xf32, #tpu.memory_space<vmem>>, vector<1x32x16xf32>
    %166 = vector.shape_cast %165 : vector<1x32x16xf32> to vector<32x16xf32>
    %cst_84 = arith.constant dense<0.000000e+00> : vector<16x16xf32>
    %167 = tpu.matmul %117, %166, %cst_84 {dimension_numbers = #tpu.dot_dimension_numbers<[1], [0], [0], [1], [0, 0, 1, 1], [], []>} : vector<16x32xf32>, vector<32x16xf32>, vector<16x16xf32> -> vector<16x16xf32>
    %c3_85 = arith.constant 3 : index
    %c0_86 = arith.constant 0 : index
    %c0_87 = arith.constant 0 : index
    %168 = vector.load %arg15[%c3_85, %c0_86, %c0_87] : memref<6x1x16xf32, #tpu.memory_space<vmem>>, vector<1x1x16xf32>
    %169 = vector.shape_cast %168 : vector<1x1x16xf32> to vector<1x16xf32>
    %170 = vector.broadcast %169 : vector<1x16xf32> to vector<16x16xf32>
    %171 = arith.addf %167, %170 : vector<16x16xf32>
    %c5 = arith.constant 5 : index
    %c0_88 = arith.constant 0 : index
    %c0_89 = arith.constant 0 : index
    %172 = vector.load %arg14[%c5, %c0_88, %c0_89] : memref<6x32x16xf32, #tpu.memory_space<vmem>>, vector<1x32x16xf32>
    %173 = vector.shape_cast %172 : vector<1x32x16xf32> to vector<32x16xf32>
    %cst_90 = arith.constant dense<0.000000e+00> : vector<16x16xf32>
    %174 = tpu.matmul %117, %173, %cst_90 {dimension_numbers = #tpu.dot_dimension_numbers<[1], [0], [0], [1], [0, 0, 1, 1], [], []>} : vector<16x32xf32>, vector<32x16xf32>, vector<16x16xf32> -> vector<16x16xf32>
    %c5_91 = arith.constant 5 : index
    %c0_92 = arith.constant 0 : index
    %c0_93 = arith.constant 0 : index
    %175 = vector.load %arg15[%c5_91, %c0_92, %c0_93] : memref<6x1x16xf32, #tpu.memory_space<vmem>>, vector<1x1x16xf32>
    %176 = vector.shape_cast %175 : vector<1x1x16xf32> to vector<1x16xf32>
    %177 = vector.broadcast %176 : vector<1x16xf32> to vector<16x16xf32>
    %178 = arith.addf %174, %177 : vector<16x16xf32>
    %cst_94 = arith.constant dense<0.000000e+00> : vector<16x16xf32>
    %179 = tpu.matmul %164, %171, %cst_94 {dimension_numbers = #tpu.dot_dimension_numbers<[1], [1], [0], [0], [0, 0, 1, 0], [], []>} : vector<16x16xf32>, vector<16x16xf32>, vector<16x16xf32> -> vector<16x16xf32>
    %cst_95 = arith.constant 2.500000e-01 : f32
    %180 = vector.broadcast %cst_95 : f32 to vector<16x16xf32>
    %181 = arith.mulf %179, %180 : vector<16x16xf32>
    %182 = arith.addf %181, %118 : vector<16x16xf32>
    %cst_96 = arith.constant dense<0xFF800000> : vector<16xf32>
    %183 = vector.multi_reduction <maximumf>, %182, %cst_96 [1] : vector<16x16xf32> to vector<16xf32>
    %184 = vector.shape_cast %183 : vector<16xf32> to vector<16x1xf32>
    %185 = vector.broadcast %184 : vector<16x1xf32> to vector<16x16xf32>
    %186 = arith.subf %182, %185 : vector<16x16xf32>
    %187 = math.exp %186 : vector<16x16xf32>
    %cst_97 = arith.constant dense<0.000000e+00> : vector<16xf32>
    %188 = vector.multi_reduction <add>, %187, %cst_97 [1] : vector<16x16xf32> to vector<16xf32>
    %189 = vector.shape_cast %188 : vector<16xf32> to vector<16x1xf32>
    %190 = tpu.reciprocal %189 {approx = true} : vector<16x1xf32> -> vector<16x1xf32>
    %191 = vector.broadcast %190 : vector<16x1xf32> to vector<16x16xf32>
    %192 = arith.mulf %187, %191 : vector<16x16xf32>
    %cst_98 = arith.constant dense<0.000000e+00> : vector<16x16xf32>
    %193 = tpu.matmul %192, %178, %cst_98 {dimension_numbers = #tpu.dot_dimension_numbers<[1], [0], [0], [1], [0, 0, 1, 1], [], []>} : vector<16x16xf32>, vector<16x16xf32>, vector<16x16xf32> -> vector<16x16xf32>
    %c1_99 = arith.constant 1 : index
    %c0_100 = arith.constant 0 : index
    %c0_101 = arith.constant 0 : index
    %194 = vector.load %arg16[%c1_99, %c0_100, %c0_101] : memref<2x16x32xf32, #tpu.memory_space<vmem>>, vector<1x16x32xf32>
    %195 = vector.shape_cast %194 : vector<1x16x32xf32> to vector<16x32xf32>
    %cst_102 = arith.constant dense<0.000000e+00> : vector<16x32xf32>
    %196 = tpu.matmul %193, %195, %cst_102 {dimension_numbers = #tpu.dot_dimension_numbers<[1], [0], [0], [1], [0, 0, 1, 1], [], []>} : vector<16x16xf32>, vector<16x32xf32>, vector<16x32xf32> -> vector<16x32xf32>
    %197 = arith.addf %157, %196 : vector<16x32xf32>
    %c0_103 = arith.constant 0 : index
    %c0_104 = arith.constant 0 : index
    %198 = vector.load %arg17[%c0_103, %c0_104] : memref<1x32xf32, #tpu.memory_space<vmem>>, vector<1x32xf32>
    %199 = vector.broadcast %198 : vector<1x32xf32> to vector<16x32xf32>
    %200 = arith.addf %197, %199 : vector<16x32xf32>
    %201 = arith.addf %200, %117 : vector<16x32xf32>
    %c0_105 = arith.constant 0 : index
    %c0_106 = arith.constant 0 : index
    %202 = vector.load %arg18[%c0_105, %c0_106] : memref<1x32xf32, #tpu.memory_space<vmem>>, vector<1x32xf32>
    %c0_107 = arith.constant 0 : index
    %c0_108 = arith.constant 0 : index
    %203 = vector.load %arg19[%c0_107, %c0_108] : memref<1x32xf32, #tpu.memory_space<vmem>>, vector<1x32xf32>
    %cst_109 = arith.constant dense<0.000000e+00> : vector<16xf32>
    %204 = vector.multi_reduction <add>, %201, %cst_109 [1] : vector<16x32xf32> to vector<16xf32>
    %205 = vector.shape_cast %204 : vector<16xf32> to vector<16x1xf32>
    %cst_110 = arith.constant 3.200000e+01 : f32
    %206 = vector.broadcast %cst_110 : f32 to vector<16x1xf32>
    %207 = arith.divf %205, %206 : vector<16x1xf32>
    %208 = vector.broadcast %207 : vector<16x1xf32> to vector<16x32xf32>
    %209 = arith.subf %201, %208 : vector<16x32xf32>
    %210 = arith.mulf %209, %209 : vector<16x32xf32>
    %cst_111 = arith.constant dense<0.000000e+00> : vector<16xf32>
    %211 = vector.multi_reduction <add>, %210, %cst_111 [1] : vector<16x32xf32> to vector<16xf32>
    %212 = vector.shape_cast %211 : vector<16xf32> to vector<16x1xf32>
    %cst_112 = arith.constant 3.200000e+01 : f32
    %213 = vector.broadcast %cst_112 : f32 to vector<16x1xf32>
    %214 = arith.divf %212, %213 : vector<16x1xf32>
    %215 = vector.broadcast %207 : vector<16x1xf32> to vector<16x32xf32>
    %216 = arith.subf %201, %215 : vector<16x32xf32>
    %cst_113 = arith.constant 9.99999996E-13 : f32
    %217 = vector.broadcast %cst_113 : f32 to vector<16x1xf32>
    %218 = arith.addf %214, %217 : vector<16x1xf32>
    %219 = math.rsqrt %218 : vector<16x1xf32>
    %220 = vector.broadcast %219 : vector<16x1xf32> to vector<16x32xf32>
    %221 = arith.mulf %216, %220 : vector<16x32xf32>
    %222 = vector.broadcast %202 : vector<1x32xf32> to vector<16x32xf32>
    %223 = arith.mulf %221, %222 : vector<16x32xf32>
    %224 = vector.broadcast %203 : vector<1x32xf32> to vector<16x32xf32>
    %225 = arith.addf %223, %224 : vector<16x32xf32>
    %c0_114 = arith.constant 0 : index
    %c0_115 = arith.constant 0 : index
    %226 = vector.load %arg20[%c0_114, %c0_115] : memref<32x64xf32, #tpu.memory_space<vmem>>, vector<32x64xf32>
    %cst_116 = arith.constant dense<0.000000e+00> : vector<16x64xf32>
    %227 = tpu.matmul %225, %226, %cst_116 {dimension_numbers = #tpu.dot_dimension_numbers<[1], [0], [0], [1], [0, 0, 1, 1], [], []>} : vector<16x32xf32>, vector<32x64xf32>, vector<16x64xf32> -> vector<16x64xf32>
    %c0_117 = arith.constant 0 : index
    %c0_118 = arith.constant 0 : index
    %228 = vector.load %arg21[%c0_117, %c0_118] : memref<1x64xf32, #tpu.memory_space<vmem>>, vector<1x64xf32>
    %229 = vector.broadcast %228 : vector<1x64xf32> to vector<16x64xf32>
    %230 = arith.addf %227, %229 : vector<16x64xf32>
    %231 = arith.mulf %230, %230 : vector<16x64xf32>
    %232 = arith.mulf %230, %231 : vector<16x64xf32>
    %cst_119 = arith.constant 4.471500e-02 : f32
    %233 = vector.broadcast %cst_119 : f32 to vector<16x64xf32>
    %234 = arith.mulf %233, %232 : vector<16x64xf32>
    %235 = arith.addf %230, %234 : vector<16x64xf32>
    %cst_120 = arith.constant 0.797884583 : f32
    %236 = vector.broadcast %cst_120 : f32 to vector<16x64xf32>
    %237 = arith.mulf %236, %235 : vector<16x64xf32>
    %238 = math.tanh %237 : vector<16x64xf32>
    %cst_121 = arith.constant 1.000000e+00 : f32
    %239 = vector.broadcast %cst_121 : f32 to vector<16x64xf32>
    %240 = arith.addf %239, %238 : vector<16x64xf32>
    %cst_122 = arith.constant 5.000000e-01 : f32
    %241 = vector.broadcast %cst_122 : f32 to vector<16x64xf32>
    %242 = arith.mulf %241, %240 : vector<16x64xf32>
    %243 = arith.mulf %230, %242 : vector<16x64xf32>
    %c0_123 = arith.constant 0 : index
    %c0_124 = arith.constant 0 : index
    %244 = vector.load %arg22[%c0_123, %c0_124] : memref<64x32xf32, #tpu.memory_space<vmem>>, vector<64x32xf32>
    %cst_125 = arith.constant dense<0.000000e+00> : vector<16x32xf32>
    %245 = tpu.matmul %243, %244, %cst_125 {dimension_numbers = #tpu.dot_dimension_numbers<[1], [0], [0], [1], [0, 0, 1, 1], [], []>} : vector<16x64xf32>, vector<64x32xf32>, vector<16x32xf32> -> vector<16x32xf32>
    %c0_126 = arith.constant 0 : index
    %c0_127 = arith.constant 0 : index
    %246 = vector.load %arg23[%c0_126, %c0_127] : memref<1x32xf32, #tpu.memory_space<vmem>>, vector<1x32xf32>
    %247 = vector.broadcast %246 : vector<1x32xf32> to vector<16x32xf32>
    %248 = arith.addf %245, %247 : vector<16x32xf32>
    %249 = arith.addf %248, %225 : vector<16x32xf32>
    %c0_128 = arith.constant 0 : index
    %c0_129 = arith.constant 0 : index
    %250 = vector.load %arg24[%c0_128, %c0_129] : memref<1x32xf32, #tpu.memory_space<vmem>>, vector<1x32xf32>
    %c0_130 = arith.constant 0 : index
    %c0_131 = arith.constant 0 : index
    %251 = vector.load %arg25[%c0_130, %c0_131] : memref<1x32xf32, #tpu.memory_space<vmem>>, vector<1x32xf32>
    %cst_132 = arith.constant dense<0.000000e+00> : vector<16xf32>
    %252 = vector.multi_reduction <add>, %249, %cst_132 [1] : vector<16x32xf32> to vector<16xf32>
    %253 = vector.shape_cast %252 : vector<16xf32> to vector<16x1xf32>
    %cst_133 = arith.constant 3.200000e+01 : f32
    %254 = vector.broadcast %cst_133 : f32 to vector<16x1xf32>
    %255 = arith.divf %253, %254 : vector<16x1xf32>
    %256 = vector.broadcast %255 : vector<16x1xf32> to vector<16x32xf32>
    %257 = arith.subf %249, %256 : vector<16x32xf32>
    %258 = arith.mulf %257, %257 : vector<16x32xf32>
    %cst_134 = arith.constant dense<0.000000e+00> : vector<16xf32>
    %259 = vector.multi_reduction <add>, %258, %cst_134 [1] : vector<16x32xf32> to vector<16xf32>
    %260 = vector.shape_cast %259 : vector<16xf32> to vector<16x1xf32>
    %cst_135 = arith.constant 3.200000e+01 : f32
    %261 = vector.broadcast %cst_135 : f32 to vector<16x1xf32>
    %262 = arith.divf %260, %261 : vector<16x1xf32>
    %263 = vector.broadcast %255 : vector<16x1xf32> to vector<16x32xf32>
    %264 = arith.subf %249, %263 : vector<16x32xf32>
    %cst_136 = arith.constant 9.99999996E-13 : f32
    %265 = vector.broadcast %cst_136 : f32 to vector<16x1xf32>
    %266 = arith.addf %262, %265 : vector<16x1xf32>
    %267 = math.rsqrt %266 : vector<16x1xf32>
    %268 = vector.broadcast %267 : vector<16x1xf32> to vector<16x32xf32>
    %269 = arith.mulf %264, %268 : vector<16x32xf32>
    %270 = vector.broadcast %250 : vector<1x32xf32> to vector<16x32xf32>
    %271 = arith.mulf %269, %270 : vector<16x32xf32>
    %272 = vector.broadcast %251 : vector<1x32xf32> to vector<16x32xf32>
    %273 = arith.addf %271, %272 : vector<16x32xf32>
    %c0_137 = arith.constant 0 : index
    %c0_138 = arith.constant 0 : index
    %c0_139 = arith.constant 0 : index
    %274 = vector.load %arg26[%c0_137, %c0_138, %c0_139] : memref<6x32x16xf32, #tpu.memory_space<vmem>>, vector<1x32x16xf32>
    %275 = vector.shape_cast %274 : vector<1x32x16xf32> to vector<32x16xf32>
    %cst_140 = arith.constant dense<0.000000e+00> : vector<16x16xf32>
    %276 = tpu.matmul %273, %275, %cst_140 {dimension_numbers = #tpu.dot_dimension_numbers<[1], [0], [0], [1], [0, 0, 1, 1], [], []>} : vector<16x32xf32>, vector<32x16xf32>, vector<16x16xf32> -> vector<16x16xf32>
    %c0_141 = arith.constant 0 : index
    %c0_142 = arith.constant 0 : index
    %c0_143 = arith.constant 0 : index
    %277 = vector.load %arg27[%c0_141, %c0_142, %c0_143] : memref<6x1x16xf32, #tpu.memory_space<vmem>>, vector<1x1x16xf32>
    %278 = vector.shape_cast %277 : vector<1x1x16xf32> to vector<1x16xf32>
    %279 = vector.broadcast %278 : vector<1x16xf32> to vector<16x16xf32>
    %280 = arith.addf %276, %279 : vector<16x16xf32>
    %c2_144 = arith.constant 2 : index
    %c0_145 = arith.constant 0 : index
    %c0_146 = arith.constant 0 : index
    %281 = vector.load %arg26[%c2_144, %c0_145, %c0_146] : memref<6x32x16xf32, #tpu.memory_space<vmem>>, vector<1x32x16xf32>
    %282 = vector.shape_cast %281 : vector<1x32x16xf32> to vector<32x16xf32>
    %cst_147 = arith.constant dense<0.000000e+00> : vector<16x16xf32>
    %283 = tpu.matmul %273, %282, %cst_147 {dimension_numbers = #tpu.dot_dimension_numbers<[1], [0], [0], [1], [0, 0, 1, 1], [], []>} : vector<16x32xf32>, vector<32x16xf32>, vector<16x16xf32> -> vector<16x16xf32>
    %c2_148 = arith.constant 2 : index
    %c0_149 = arith.constant 0 : index
    %c0_150 = arith.constant 0 : index
    %284 = vector.load %arg27[%c2_148, %c0_149, %c0_150] : memref<6x1x16xf32, #tpu.memory_space<vmem>>, vector<1x1x16xf32>
    %285 = vector.shape_cast %284 : vector<1x1x16xf32> to vector<1x16xf32>
    %286 = vector.broadcast %285 : vector<1x16xf32> to vector<16x16xf32>
    %287 = arith.addf %283, %286 : vector<16x16xf32>
    %c4_151 = arith.constant 4 : index
    %c0_152 = arith.constant 0 : index
    %c0_153 = arith.constant 0 : index
    %288 = vector.load %arg26[%c4_151, %c0_152, %c0_153] : memref<6x32x16xf32, #tpu.memory_space<vmem>>, vector<1x32x16xf32>
    %289 = vector.shape_cast %288 : vector<1x32x16xf32> to vector<32x16xf32>
    %cst_154 = arith.constant dense<0.000000e+00> : vector<16x16xf32>
    %290 = tpu.matmul %273, %289, %cst_154 {dimension_numbers = #tpu.dot_dimension_numbers<[1], [0], [0], [1], [0, 0, 1, 1], [], []>} : vector<16x32xf32>, vector<32x16xf32>, vector<16x16xf32> -> vector<16x16xf32>
    %c4_155 = arith.constant 4 : index
    %c0_156 = arith.constant 0 : index
    %c0_157 = arith.constant 0 : index
    %291 = vector.load %arg27[%c4_155, %c0_156, %c0_157] : memref<6x1x16xf32, #tpu.memory_space<vmem>>, vector<1x1x16xf32>
    %292 = vector.shape_cast %291 : vector<1x1x16xf32> to vector<1x16xf32>
    %293 = vector.broadcast %292 : vector<1x16xf32> to vector<16x16xf32>
    %294 = arith.addf %290, %293 : vector<16x16xf32>
    %cst_158 = arith.constant dense<0.000000e+00> : vector<16x16xf32>
    %295 = tpu.matmul %280, %287, %cst_158 {dimension_numbers = #tpu.dot_dimension_numbers<[1], [1], [0], [0], [0, 0, 1, 0], [], []>} : vector<16x16xf32>, vector<16x16xf32>, vector<16x16xf32> -> vector<16x16xf32>
    %cst_159 = arith.constant 2.500000e-01 : f32
    %296 = vector.broadcast %cst_159 : f32 to vector<16x16xf32>
    %297 = arith.mulf %295, %296 : vector<16x16xf32>
    %298 = arith.addf %297, %118 : vector<16x16xf32>
    %cst_160 = arith.constant dense<0xFF800000> : vector<16xf32>
    %299 = vector.multi_reduction <maximumf>, %298, %cst_160 [1] : vector<16x16xf32> to vector<16xf32>
    %300 = vector.shape_cast %299 : vector<16xf32> to vector<16x1xf32>
    %301 = vector.broadcast %300 : vector<16x1xf32> to vector<16x16xf32>
    %302 = arith.subf %298, %301 : vector<16x16xf32>
    %303 = math.exp %302 : vector<16x16xf32>
    %cst_161 = arith.constant dense<0.000000e+00> : vector<16xf32>
    %304 = vector.multi_reduction <add>, %303, %cst_161 [1] : vector<16x16xf32> to vector<16xf32>
    %305 = vector.shape_cast %304 : vector<16xf32> to vector<16x1xf32>
    %306 = tpu.reciprocal %305 {approx = true} : vector<16x1xf32> -> vector<16x1xf32>
    %307 = vector.broadcast %306 : vector<16x1xf32> to vector<16x16xf32>
    %308 = arith.mulf %303, %307 : vector<16x16xf32>
    %cst_162 = arith.constant dense<0.000000e+00> : vector<16x16xf32>
    %309 = tpu.matmul %308, %294, %cst_162 {dimension_numbers = #tpu.dot_dimension_numbers<[1], [0], [0], [1], [0, 0, 1, 1], [], []>} : vector<16x16xf32>, vector<16x16xf32>, vector<16x16xf32> -> vector<16x16xf32>
    %c0_163 = arith.constant 0 : index
    %c0_164 = arith.constant 0 : index
    %c0_165 = arith.constant 0 : index
    %310 = vector.load %arg28[%c0_163, %c0_164, %c0_165] : memref<2x16x32xf32, #tpu.memory_space<vmem>>, vector<1x16x32xf32>
    %311 = vector.shape_cast %310 : vector<1x16x32xf32> to vector<16x32xf32>
    %cst_166 = arith.constant dense<0.000000e+00> : vector<16x32xf32>
    %312 = tpu.matmul %309, %311, %cst_166 {dimension_numbers = #tpu.dot_dimension_numbers<[1], [0], [0], [1], [0, 0, 1, 1], [], []>} : vector<16x16xf32>, vector<16x32xf32>, vector<16x32xf32> -> vector<16x32xf32>
    %c1_167 = arith.constant 1 : index
    %c0_168 = arith.constant 0 : index
    %c0_169 = arith.constant 0 : index
    %313 = vector.load %arg26[%c1_167, %c0_168, %c0_169] : memref<6x32x16xf32, #tpu.memory_space<vmem>>, vector<1x32x16xf32>
    %314 = vector.shape_cast %313 : vector<1x32x16xf32> to vector<32x16xf32>
    %cst_170 = arith.constant dense<0.000000e+00> : vector<16x16xf32>
    %315 = tpu.matmul %273, %314, %cst_170 {dimension_numbers = #tpu.dot_dimension_numbers<[1], [0], [0], [1], [0, 0, 1, 1], [], []>} : vector<16x32xf32>, vector<32x16xf32>, vector<16x16xf32> -> vector<16x16xf32>
    %c1_171 = arith.constant 1 : index
    %c0_172 = arith.constant 0 : index
    %c0_173 = arith.constant 0 : index
    %316 = vector.load %arg27[%c1_171, %c0_172, %c0_173] : memref<6x1x16xf32, #tpu.memory_space<vmem>>, vector<1x1x16xf32>
    %317 = vector.shape_cast %316 : vector<1x1x16xf32> to vector<1x16xf32>
    %318 = vector.broadcast %317 : vector<1x16xf32> to vector<16x16xf32>
    %319 = arith.addf %315, %318 : vector<16x16xf32>
    %c3_174 = arith.constant 3 : index
    %c0_175 = arith.constant 0 : index
    %c0_176 = arith.constant 0 : index
    %320 = vector.load %arg26[%c3_174, %c0_175, %c0_176] : memref<6x32x16xf32, #tpu.memory_space<vmem>>, vector<1x32x16xf32>
    %321 = vector.shape_cast %320 : vector<1x32x16xf32> to vector<32x16xf32>
    %cst_177 = arith.constant dense<0.000000e+00> : vector<16x16xf32>
    %322 = tpu.matmul %273, %321, %cst_177 {dimension_numbers = #tpu.dot_dimension_numbers<[1], [0], [0], [1], [0, 0, 1, 1], [], []>} : vector<16x32xf32>, vector<32x16xf32>, vector<16x16xf32> -> vector<16x16xf32>
    %c3_178 = arith.constant 3 : index
    %c0_179 = arith.constant 0 : index
    %c0_180 = arith.constant 0 : index
    %323 = vector.load %arg27[%c3_178, %c0_179, %c0_180] : memref<6x1x16xf32, #tpu.memory_space<vmem>>, vector<1x1x16xf32>
    %324 = vector.shape_cast %323 : vector<1x1x16xf32> to vector<1x16xf32>
    %325 = vector.broadcast %324 : vector<1x16xf32> to vector<16x16xf32>
    %326 = arith.addf %322, %325 : vector<16x16xf32>
    %c5_181 = arith.constant 5 : index
    %c0_182 = arith.constant 0 : index
    %c0_183 = arith.constant 0 : index
    %327 = vector.load %arg26[%c5_181, %c0_182, %c0_183] : memref<6x32x16xf32, #tpu.memory_space<vmem>>, vector<1x32x16xf32>
    %328 = vector.shape_cast %327 : vector<1x32x16xf32> to vector<32x16xf32>
    %cst_184 = arith.constant dense<0.000000e+00> : vector<16x16xf32>
    %329 = tpu.matmul %273, %328, %cst_184 {dimension_numbers = #tpu.dot_dimension_numbers<[1], [0], [0], [1], [0, 0, 1, 1], [], []>} : vector<16x32xf32>, vector<32x16xf32>, vector<16x16xf32> -> vector<16x16xf32>
    %c5_185 = arith.constant 5 : index
    %c0_186 = arith.constant 0 : index
    %c0_187 = arith.constant 0 : index
    %330 = vector.load %arg27[%c5_185, %c0_186, %c0_187] : memref<6x1x16xf32, #tpu.memory_space<vmem>>, vector<1x1x16xf32>
    %331 = vector.shape_cast %330 : vector<1x1x16xf32> to vector<1x16xf32>
    %332 = vector.broadcast %331 : vector<1x16xf32> to vector<16x16xf32>
    %333 = arith.addf %329, %332 : vector<16x16xf32>
    %cst_188 = arith.constant dense<0.000000e+00> : vector<16x16xf32>
    %334 = tpu.matmul %319, %326, %cst_188 {dimension_numbers = #tpu.dot_dimension_numbers<[1], [1], [0], [0], [0, 0, 1, 0], [], []>} : vector<16x16xf32>, vector<16x16xf32>, vector<16x16xf32> -> vector<16x16xf32>
    %cst_189 = arith.constant 2.500000e-01 : f32
    %335 = vector.broadcast %cst_189 : f32 to vector<16x16xf32>
    %336 = arith.mulf %334, %335 : vector<16x16xf32>
    %337 = arith.addf %336, %118 : vector<16x16xf32>
    %cst_190 = arith.constant dense<0xFF800000> : vector<16xf32>
    %338 = vector.multi_reduction <maximumf>, %337, %cst_190 [1] : vector<16x16xf32> to vector<16xf32>
    %339 = vector.shape_cast %338 : vector<16xf32> to vector<16x1xf32>
    %340 = vector.broadcast %339 : vector<16x1xf32> to vector<16x16xf32>
    %341 = arith.subf %337, %340 : vector<16x16xf32>
    %342 = math.exp %341 : vector<16x16xf32>
    %cst_191 = arith.constant dense<0.000000e+00> : vector<16xf32>
    %343 = vector.multi_reduction <add>, %342, %cst_191 [1] : vector<16x16xf32> to vector<16xf32>
    %344 = vector.shape_cast %343 : vector<16xf32> to vector<16x1xf32>
    %345 = tpu.reciprocal %344 {approx = true} : vector<16x1xf32> -> vector<16x1xf32>
    %346 = vector.broadcast %345 : vector<16x1xf32> to vector<16x16xf32>
    %347 = arith.mulf %342, %346 : vector<16x16xf32>
    %cst_192 = arith.constant dense<0.000000e+00> : vector<16x16xf32>
    %348 = tpu.matmul %347, %333, %cst_192 {dimension_numbers = #tpu.dot_dimension_numbers<[1], [0], [0], [1], [0, 0, 1, 1], [], []>} : vector<16x16xf32>, vector<16x16xf32>, vector<16x16xf32> -> vector<16x16xf32>
    %c1_193 = arith.constant 1 : index
    %c0_194 = arith.constant 0 : index
    %c0_195 = arith.constant 0 : index
    %349 = vector.load %arg28[%c1_193, %c0_194, %c0_195] : memref<2x16x32xf32, #tpu.memory_space<vmem>>, vector<1x16x32xf32>
    %350 = vector.shape_cast %349 : vector<1x16x32xf32> to vector<16x32xf32>
    %cst_196 = arith.constant dense<0.000000e+00> : vector<16x32xf32>
    %351 = tpu.matmul %348, %350, %cst_196 {dimension_numbers = #tpu.dot_dimension_numbers<[1], [0], [0], [1], [0, 0, 1, 1], [], []>} : vector<16x16xf32>, vector<16x32xf32>, vector<16x32xf32> -> vector<16x32xf32>
    %352 = arith.addf %312, %351 : vector<16x32xf32>
    %c0_197 = arith.constant 0 : index
    %c0_198 = arith.constant 0 : index
    %353 = vector.load %arg29[%c0_197, %c0_198] : memref<1x32xf32, #tpu.memory_space<vmem>>, vector<1x32xf32>
    %354 = vector.broadcast %353 : vector<1x32xf32> to vector<16x32xf32>
    %355 = arith.addf %352, %354 : vector<16x32xf32>
    %356 = arith.addf %355, %273 : vector<16x32xf32>
    %c0_199 = arith.constant 0 : index
    %c0_200 = arith.constant 0 : index
    %357 = vector.load %arg30[%c0_199, %c0_200] : memref<1x32xf32, #tpu.memory_space<vmem>>, vector<1x32xf32>
    %c0_201 = arith.constant 0 : index
    %c0_202 = arith.constant 0 : index
    %358 = vector.load %arg31[%c0_201, %c0_202] : memref<1x32xf32, #tpu.memory_space<vmem>>, vector<1x32xf32>
    %cst_203 = arith.constant dense<0.000000e+00> : vector<16xf32>
    %359 = vector.multi_reduction <add>, %356, %cst_203 [1] : vector<16x32xf32> to vector<16xf32>
    %360 = vector.shape_cast %359 : vector<16xf32> to vector<16x1xf32>
    %cst_204 = arith.constant 3.200000e+01 : f32
    %361 = vector.broadcast %cst_204 : f32 to vector<16x1xf32>
    %362 = arith.divf %360, %361 : vector<16x1xf32>
    %363 = vector.broadcast %362 : vector<16x1xf32> to vector<16x32xf32>
    %364 = arith.subf %356, %363 : vector<16x32xf32>
    %365 = arith.mulf %364, %364 : vector<16x32xf32>
    %cst_205 = arith.constant dense<0.000000e+00> : vector<16xf32>
    %366 = vector.multi_reduction <add>, %365, %cst_205 [1] : vector<16x32xf32> to vector<16xf32>
    %367 = vector.shape_cast %366 : vector<16xf32> to vector<16x1xf32>
    %cst_206 = arith.constant 3.200000e+01 : f32
    %368 = vector.broadcast %cst_206 : f32 to vector<16x1xf32>
    %369 = arith.divf %367, %368 : vector<16x1xf32>
    %370 = vector.broadcast %362 : vector<16x1xf32> to vector<16x32xf32>
    %371 = arith.subf %356, %370 : vector<16x32xf32>
    %cst_207 = arith.constant 9.99999996E-13 : f32
    %372 = vector.broadcast %cst_207 : f32 to vector<16x1xf32>
    %373 = arith.addf %369, %372 : vector<16x1xf32>
    %374 = math.rsqrt %373 : vector<16x1xf32>
    %375 = vector.broadcast %374 : vector<16x1xf32> to vector<16x32xf32>
    %376 = arith.mulf %371, %375 : vector<16x32xf32>
    %377 = vector.broadcast %357 : vector<1x32xf32> to vector<16x32xf32>
    %378 = arith.mulf %376, %377 : vector<16x32xf32>
    %379 = vector.broadcast %358 : vector<1x32xf32> to vector<16x32xf32>
    %380 = arith.addf %378, %379 : vector<16x32xf32>
    %c0_208 = arith.constant 0 : index
    %c0_209 = arith.constant 0 : index
    %381 = vector.load %arg32[%c0_208, %c0_209] : memref<32x64xf32, #tpu.memory_space<vmem>>, vector<32x64xf32>
    %cst_210 = arith.constant dense<0.000000e+00> : vector<16x64xf32>
    %382 = tpu.matmul %380, %381, %cst_210 {dimension_numbers = #tpu.dot_dimension_numbers<[1], [0], [0], [1], [0, 0, 1, 1], [], []>} : vector<16x32xf32>, vector<32x64xf32>, vector<16x64xf32> -> vector<16x64xf32>
    %c0_211 = arith.constant 0 : index
    %c0_212 = arith.constant 0 : index
    %383 = vector.load %arg33[%c0_211, %c0_212] : memref<1x64xf32, #tpu.memory_space<vmem>>, vector<1x64xf32>
    %384 = vector.broadcast %383 : vector<1x64xf32> to vector<16x64xf32>
    %385 = arith.addf %382, %384 : vector<16x64xf32>
    %386 = arith.mulf %385, %385 : vector<16x64xf32>
    %387 = arith.mulf %385, %386 : vector<16x64xf32>
    %cst_213 = arith.constant 4.471500e-02 : f32
    %388 = vector.broadcast %cst_213 : f32 to vector<16x64xf32>
    %389 = arith.mulf %388, %387 : vector<16x64xf32>
    %390 = arith.addf %385, %389 : vector<16x64xf32>
    %cst_214 = arith.constant 0.797884583 : f32
    %391 = vector.broadcast %cst_214 : f32 to vector<16x64xf32>
    %392 = arith.mulf %391, %390 : vector<16x64xf32>
    %393 = math.tanh %392 : vector<16x64xf32>
    %cst_215 = arith.constant 1.000000e+00 : f32
    %394 = vector.broadcast %cst_215 : f32 to vector<16x64xf32>
    %395 = arith.addf %394, %393 : vector<16x64xf32>
    %cst_216 = arith.constant 5.000000e-01 : f32
    %396 = vector.broadcast %cst_216 : f32 to vector<16x64xf32>
    %397 = arith.mulf %396, %395 : vector<16x64xf32>
    %398 = arith.mulf %385, %397 : vector<16x64xf32>
    %c0_217 = arith.constant 0 : index
    %c0_218 = arith.constant 0 : index
    %399 = vector.load %arg34[%c0_217, %c0_218] : memref<64x32xf32, #tpu.memory_space<vmem>>, vector<64x32xf32>
    %cst_219 = arith.constant dense<0.000000e+00> : vector<16x32xf32>
    %400 = tpu.matmul %398, %399, %cst_219 {dimension_numbers = #tpu.dot_dimension_numbers<[1], [0], [0], [1], [0, 0, 1, 1], [], []>} : vector<16x64xf32>, vector<64x32xf32>, vector<16x32xf32> -> vector<16x32xf32>
    %c0_220 = arith.constant 0 : index
    %c0_221 = arith.constant 0 : index
    %401 = vector.load %arg35[%c0_220, %c0_221] : memref<1x32xf32, #tpu.memory_space<vmem>>, vector<1x32xf32>
    %402 = vector.broadcast %401 : vector<1x32xf32> to vector<16x32xf32>
    %403 = arith.addf %400, %402 : vector<16x32xf32>
    %404 = arith.addf %403, %380 : vector<16x32xf32>
    %c0_222 = arith.constant 0 : index
    %c0_223 = arith.constant 0 : index
    %405 = vector.load %arg36[%c0_222, %c0_223] : memref<1x32xf32, #tpu.memory_space<vmem>>, vector<1x32xf32>
    %c0_224 = arith.constant 0 : index
    %c0_225 = arith.constant 0 : index
    %406 = vector.load %arg37[%c0_224, %c0_225] : memref<1x32xf32, #tpu.memory_space<vmem>>, vector<1x32xf32>
    %cst_226 = arith.constant dense<0.000000e+00> : vector<16xf32>
    %407 = vector.multi_reduction <add>, %404, %cst_226 [1] : vector<16x32xf32> to vector<16xf32>
    %408 = vector.shape_cast %407 : vector<16xf32> to vector<16x1xf32>
    %cst_227 = arith.constant 3.200000e+01 : f32
    %409 = vector.broadcast %cst_227 : f32 to vector<16x1xf32>
    %410 = arith.divf %408, %409 : vector<16x1xf32>
    %411 = vector.broadcast %410 : vector<16x1xf32> to vector<16x32xf32>
    %412 = arith.subf %404, %411 : vector<16x32xf32>
    %413 = arith.mulf %412, %412 : vector<16x32xf32>
    %cst_228 = arith.constant dense<0.000000e+00> : vector<16xf32>
    %414 = vector.multi_reduction <add>, %413, %cst_228 [1] : vector<16x32xf32> to vector<16xf32>
    %415 = vector.shape_cast %414 : vector<16xf32> to vector<16x1xf32>
    %cst_229 = arith.constant 3.200000e+01 : f32
    %416 = vector.broadcast %cst_229 : f32 to vector<16x1xf32>
    %417 = arith.divf %415, %416 : vector<16x1xf32>
    %418 = vector.broadcast %410 : vector<16x1xf32> to vector<16x32xf32>
    %419 = arith.subf %404, %418 : vector<16x32xf32>
    %cst_230 = arith.constant 9.99999996E-13 : f32
    %420 = vector.broadcast %cst_230 : f32 to vector<16x1xf32>
    %421 = arith.addf %417, %420 : vector<16x1xf32>
    %422 = math.rsqrt %421 : vector<16x1xf32>
    %423 = vector.broadcast %422 : vector<16x1xf32> to vector<16x32xf32>
    %424 = arith.mulf %419, %423 : vector<16x32xf32>
    %425 = vector.broadcast %405 : vector<1x32xf32> to vector<16x32xf32>
    %426 = arith.mulf %424, %425 : vector<16x32xf32>
    %427 = vector.broadcast %406 : vector<1x32xf32> to vector<16x32xf32>
    %428 = arith.addf %426, %427 : vector<16x32xf32>
    %c0_231 = arith.constant 0 : index
    %c0_232 = arith.constant 0 : index
    %429 = vector.load %arg13[%c0_231, %c0_232] : memref<2x16xf32, #tpu.memory_space<vmem>>, vector<2x16xf32>
    %cst_233 = arith.constant dense<0.000000e+00> : vector<2x32xf32>
    %430 = tpu.matmul %429, %428, %cst_233 {dimension_numbers = #tpu.dot_dimension_numbers<[1], [0], [0], [1], [0, 0, 1, 1], [], []>} : vector<2x16xf32>, vector<16x32xf32>, vector<2x32xf32> -> vector<2x32xf32>
    %c0_234 = arith.constant 0 : index
    %c0_235 = arith.constant 0 : index
    %431 = vector.load %arg38[%c0_234, %c0_235] : memref<32x32xf32, #tpu.memory_space<vmem>>, vector<32x32xf32>
    %cst_236 = arith.constant dense<0.000000e+00> : vector<2x32xf32>
    %432 = tpu.matmul %430, %431, %cst_236 {dimension_numbers = #tpu.dot_dimension_numbers<[1], [0], [0], [1], [0, 0, 1, 1], [], []>} : vector<2x32xf32>, vector<32x32xf32>, vector<2x32xf32> -> vector<2x32xf32>
    %c0_237 = arith.constant 0 : index
    %c0_238 = arith.constant 0 : index
    %433 = vector.load %arg39[%c0_237, %c0_238] : memref<1x32xf32, #tpu.memory_space<vmem>>, vector<1x32xf32>
    %434 = vector.broadcast %433 : vector<1x32xf32> to vector<2x32xf32>
    %435 = arith.addf %432, %434 : vector<2x32xf32>
    %436 = math.tanh %435 : vector<2x32xf32>
    %c0_239 = arith.constant 0 : index
    %c0_240 = arith.constant 0 : index
    %437 = vector.load %arg40[%c0_239, %c0_240] : memref<32x16xf32, #tpu.memory_space<vmem>>, vector<32x16xf32>
    %cst_241 = arith.constant dense<0.000000e+00> : vector<2x16xf32>
    %438 = tpu.matmul %436, %437, %cst_241 {dimension_numbers = #tpu.dot_dimension_numbers<[1], [0], [0], [1], [0, 0, 1, 1], [], []>} : vector<2x32xf32>, vector<32x16xf32>, vector<2x16xf32> -> vector<2x16xf32>
    %c0_242 = arith.constant 0 : index
    %c0_243 = arith.constant 0 : index
    %439 = vector.load %arg41[%c0_242, %c0_243] : memref<1x16xf32, #tpu.memory_space<vmem>>, vector<1x16xf32>
    %440 = vector.broadcast %439 : vector<1x16xf32> to vector<2x16xf32>
    %441 = arith.addf %438, %440 : vector<2x16xf32>
    %c0_244 = arith.constant 0 : index
    %c0_245 = arith.constant 0 : index
    %442 = vector.load %arg42[%c0_244, %c0_245] : memref<1x16xf32, #tpu.memory_space<vmem>>, vector<1x16xf32>
    %c0_246 = arith.constant 0 : index
    %c0_247 = arith.constant 0 : index
    %443 = vector.load %arg43[%c0_246, %c0_247] : memref<1x16xf32, #tpu.memory_space<vmem>>, vector<1x16xf32>
    %cst_248 = arith.constant dense<0.000000e+00> : vector<2xf32>
    %444 = vector.multi_reduction <add>, %441, %cst_248 [1] : vector<2x16xf32> to vector<2xf32>
    %445 = vector.shape_cast %444 : vector<2xf32> to vector<2x1xf32>
    %cst_249 = arith.constant 1.600000e+01 : f32
    %446 = vector.broadcast %cst_249 : f32 to vector<2x1xf32>
    %447 = arith.divf %445, %446 : vector<2x1xf32>
    %448 = vector.broadcast %447 : vector<2x1xf32> to vector<2x16xf32>
    %449 = arith.subf %441, %448 : vector<2x16xf32>
    %450 = arith.mulf %449, %449 : vector<2x16xf32>
    %cst_250 = arith.constant dense<0.000000e+00> : vector<2xf32>
    %451 = vector.multi_reduction <add>, %450, %cst_250 [1] : vector<2x16xf32> to vector<2xf32>
    %452 = vector.shape_cast %451 : vector<2xf32> to vector<2x1xf32>
    %cst_251 = arith.constant 1.600000e+01 : f32
    %453 = vector.broadcast %cst_251 : f32 to vector<2x1xf32>
    %454 = arith.divf %452, %453 : vector<2x1xf32>
    %455 = vector.broadcast %447 : vector<2x1xf32> to vector<2x16xf32>
    %456 = arith.subf %441, %455 : vector<2x16xf32>
    %cst_252 = arith.constant 9.99999974E-6 : f32
    %457 = vector.broadcast %cst_252 : f32 to vector<2x1xf32>
    %458 = arith.addf %454, %457 : vector<2x1xf32>
    %459 = math.rsqrt %458 : vector<2x1xf32>
    %460 = vector.broadcast %459 : vector<2x1xf32> to vector<2x16xf32>
    %461 = arith.mulf %456, %460 : vector<2x16xf32>
    %462 = vector.broadcast %442 : vector<1x16xf32> to vector<2x16xf32>
    %463 = arith.mulf %461, %462 : vector<2x16xf32>
    %464 = vector.broadcast %443 : vector<1x16xf32> to vector<2x16xf32>
    %465 = arith.addf %463, %464 : vector<2x16xf32>
    %cst_253 = arith.constant 0.000000e+00 : f32
    %466 = vector.broadcast %cst_253 : f32 to vector<2x16xf32>
    %467 = arith.maximumf %465, %466 : vector<2x16xf32>
    %c0_254 = arith.constant 0 : index
    %c0_255 = arith.constant 0 : index
    %468 = vector.load %arg44[%c0_254, %c0_255] : memref<16x1xf32, #tpu.memory_space<vmem>>, vector<16x1xf32>
    %cst_256 = arith.constant dense<0.000000e+00> : vector<2x1xf32>
    %469 = tpu.matmul %467, %468, %cst_256 {dimension_numbers = #tpu.dot_dimension_numbers<[1], [0], [0], [1], [0, 0, 1, 1], [], []>} : vector<2x16xf32>, vector<16x1xf32>, vector<2x1xf32> -> vector<2x1xf32>
    %c0_257 = arith.constant 0 : index
    %c0_258 = arith.constant 0 : index
    %470 = vector.load %arg45[%c0_257, %c0_258] : memref<1x1xf32, #tpu.memory_space<vmem>>, vector<1x1xf32>
    %471 = vector.broadcast %470 : vector<1x1xf32> to vector<2x1xf32>
    %472 = arith.addf %469, %471 : vector<2x1xf32>
    %c0_259 = arith.constant 0 : index
    %c0_260 = arith.constant 0 : index
    %473 = vector.load %arg46[%c0_259, %c0_260] : memref<2x1xf32, #tpu.memory_space<vmem>>, vector<2x1xf32>
    tpu.vector_store %arg46[%c0_259, %c0_260], %472 {strides = array<i32>} : memref<2x1xf32, #tpu.memory_space<vmem>>, vector<2x1xf32>,
    return
  }
}

</mosaic_0001>

<bundles_post_ra>
// kernel: hallucination_detector_forward.1
= control target key start
LH: loop header
LB: loop body
LE: loop exit
PB: predicated region body
PF: predicated region fallthrough
CT: control target
= control target key end

     0   :  { %v4786_v0 = vmov 0   ;;  %s4787_s3 = smov 5   ;;  %vm258_vm0 = vcmask 7168   ;;  %s4788_s7 = smov 6   ;;  %vm208_vm5 = vcmask 261120   ;;  %vm770_vm6 = vcmask 130048   ;;  %s5278_s0 = inlined_call_operand.smem [shape: u32[47], index: -1, kind: input, shape index: {}] }
   0x1   :  { %4701 = vset.pattern.permute.xlu0 %v4786_v0  ;;  %s3659_s6 = sld [smem:[%s5278_s0 + %s4787_s3]]   ;;  %s4789_s11 = smov 7   ;;  %vm4976_vm7 = vmpackc.low %vm770_vm6, %vm770_vm6  ;;  %vm1770_vm8 = vcmask 523264   ;;  %vm4822_vm9 = vmmov 0   ;;  %vm3537_vm10 = vcmask 123904   ;;  %vm3649_vm11 = vcmask 1024  }
   0x2   :  { %s3660_s10 = sld [smem:[%s5278_s0 + %s4788_s7]]   ;;  %s4790_s18 = smov 1  }
   0x3   :  { %s3661_s14 = sld [smem:[%s5278_s0 + %s4789_s11]]   ;;  %s4791_s22 = smov 2  }
   0x4   :  { %s1_s17 = sld [smem:[%s5278_s0]]   ;;  %s4792_s26 = smov 10  }
   0x5   :  { %s3655_s21 = sld [smem:[%s5278_s0 + %s4790_s18]]   ;;  %s4793_s30 = smov 8  }
   0x6   :  { %s3656_s25 = sld [smem:[%s5278_s0 + %s4791_s22]]   ;;  %s4794_s4 = smov 9  }
   0x7   :  { %v252_v1 = vld [vmem:[%s3659_s6] sm:$0xff]  ;;  %v253_v2 = vld [vmem:[%s3659_s6 + $0x8] sm:$0xff]  ;;  %s4882_s29 = sld [smem:[%s5278_s0 + %s4792_s26]]   ;;  %s4795_s8 = smov 14  }
   0x8   :  { %v254_v3 = vmax.f32 %v252_v1, -20.0  ;;  %v255_v4 = vmax.f32 %v253_v2, -20.0  ;;  %v3704_v59 = vld [vmem:[%s3660_s10] ss:$0 sm:$0xff]  ;;  %s3662_s3 = sld [smem:[%s5278_s0 + %s4793_s30]]   ;;  %s4796_s12 = smov 3  }
   0x9   :  { %v3705_v61 = vld [vmem:[%s3661_s14] ss:$0 sm:$0xff]  ;;  %s3663_s7 = sld [smem:[%s5278_s0 + %s4794_s4]]   ;;  %s4797_s16 = smov 11  }
   0xa   :  { %v256_v5 = vmin.f32 %v254_v3, 0.0  ;;  %v257_v6 = vmin.f32 %v255_v4, 0.0  ;;  %s4923_s11 = sld [smem:[%s5278_s0 + %s4795_s8]]   ;;  %s4798_s20 = smov 4  }
   0xb   :  { %s3657_s15 = sld [smem:[%s5278_s0 + %s4796_s12]]   ;;  %s4799_s24 = smov 15  }
   0xc   :  { %v259_v7 = vsel %vm258_vm0, %v256_v5, 0.0  ;;  %v289_v8 = vsel %vm258_vm0, %v257_v6, 0.0  ;;  %s3665_s19 = sld [smem:[%s5278_s0 + %s4797_s16]]   ;;  %s4800_s28 = smov 12  }
   0xd   :  { %v260_v9 = vrot.slane %v259_v7, 4  ;;  %v290_v10 = vrot.slane %v289_v8, 4  ;;  %s3658_s23 = sld [smem:[%s5278_s0 + %s4798_s20]]   ;;  %s4801_s2 = smov 16  }
   0xe   :  { %s4967_s27 = sld [smem:[%s5278_s0 + %s4799_s24]]   ;;  %s4802_s6 = smov 17  }
   0xf   :  { %v261_v11 = vadd.f32 %v260_v9, %v259_v7  ;;  %v291_v12 = vadd.f32 %v290_v10, %v289_v8  ;;  %s3666_s1 = sld [smem:[%s5278_s0 + %s4800_s28]]   ;;  %s4803_s10 = smov 20  }
  0x10   :  { %s3670_s5 = sld [smem:[%s5278_s0 + %s4801_s2]]   ;;  %s4804_s14 = smov 18  }
  0x11   :  { %v262_v13 = vrot.slane %v261_v11, 2  ;;  %v292_v14 = vrot.slane %v291_v12, 2  ;;  %s3671_s9 = sld [smem:[%s5278_s0 + %s4802_s6]]   ;;  %s4805_s18 = smov 19  }
  0x12   :  { %s3674_s13 = sld [smem:[%s5278_s0 + %s4803_s10]]   ;;  %s4806_s22 = smov 22  }
  0x13   :  { %v263_v15 = vadd.f32 %v262_v13, %v261_v11  ;;  %v293_v16 = vadd.f32 %v292_v14, %v291_v12  ;;  %v3701_v12 = vld [vmem:[%s3656_s25] ss:$0 sm:$0xff]  ;;  %v194_v13 = vld [vmem:[%s1_s17 + $0x8] sm:$0xff]  ;;  %s3676_s25 = sld [smem:[%s5278_s0 + %s4806_s22]]   ;;  %s4807_s26 = smov 21  }
  0x14   :  { %s4808_s30 = smov 23   ;;  %s4809_s4 = smov 26  }
  0x15   :  { %v264_v17 = vrot.slane %v263_v15, 1  ;;  %v294_v18 = vrot.slane %v293_v16, 1  ;;  %s4810_s8 = smov 24   ;;  %s4811_s12 = smov 25  }
  0x16   :  { %s4812_s16 = smov 27   ;;  %s4813_s20 = smov 28  }
  0x17   :  { %v265_v19 = vadd.f32 %v264_v17, %v263_v15  ;;  %v295_v20 = vadd.f32 %v294_v18, %v293_v16  ;;  %s4814_s24 = smov 29   ;;  %s4815_s28 = smov 32  }
  0x18   :  { %s4816_s2 = smov 30   ;;  %s4817_s6 = smov 31  }
  0x19   :  { %v267_v21 = vmul.f32 0.125, %v265_v19  ;;  %v296_v22 = vmul.f32 0.125, %v295_v20  ;;  %s4818_s10 = smov 34   ;;  %s4824_s22 = smov 36  }
  0x1b   :  { %v268_v23 = vsub.f32 %v256_v5, %v267_v21  ;;  %v297_v24 = vsub.f32 %v257_v6, %v296_v22  ;;  %v192_v5 = vld [vmem:[%s3655_s21] sm:$0xff]  ;;  %v401_v22 = vld [vmem:[%s4882_s29 + $0x8] sm:$0xff]  ;;  %s3673_s21 = sld [smem:[%s5278_s0 + %s4805_s18]]   ;;  %s4820_s18 = smov 35  }
  0x1c   :  { %v193_v6 = vld [vmem:[%s1_s17] sm:$0xff]  ;;  %v196_v16 = vadd.f32 %v194_v13, %v192_v5  ;;  %s3672_s17 = sld [smem:[%s5278_s0 + %s4804_s14]]   ;;  %s4819_s14 = smov 33  }
  0x1d   :  { %v269_v25 = vmul.f32 %v268_v23, %v268_v23  ;;  %v298_v26 = vmul.f32 %v297_v24, %v297_v24  ;;  %v195_v9 = vadd.f32 %v193_v6, %v192_v5  ;;  %v400_v21 = vld [vmem:[%s4882_s29] sm:$0xff] }
  0x1e   :  { %v4875_v19 = vadd.f32 %v3701_v12, %v196_v16  ;;  %v502_v13 = vld [vmem:[%s4923_s11] sm:$0xff] }
  0x1f   :  { %v270_v27 = vsel %vm258_vm0, %v269_v25, 0.0  ;;  %v299_v28 = vsel %vm258_vm0, %v298_v26, 0.0  ;;  %v4869_v15 = vadd.f32 %v3701_v12, %v195_v9  ;;  %v403_v25 = vld [vmem:[%s4882_s29 + $0x18] sm:$0xff] }
  0x20   :  { %v271_v29 = vrot.slane %v270_v27, 4  ;;  %v300_v30 = vrot.slane %v299_v28, 4  ;;  %v212_v20 = vsel %vm208_vm5, %v4875_v19, 0.0 }
  0x21   :  { %v209_v18 = vsel %vm208_vm5, %v4869_v15, 0.0 }
  0x22   :  { %v272_v31 = vadd.f32 %v271_v29, %v270_v27  ;;  %v301_v32 = vadd.f32 %v300_v30, %v299_v28  ;;  %v404_v27 = vld [vmem:[%s4882_s29 + $0x20] sm:$0xff]  ;;  %v405_v28 = vld [vmem:[%s4882_s29 + $0x28] sm:$0xff]  ;;  %v406_v30 = vld [vmem:[%s4882_s29 + $0x30] sm:$0xff] }
  0x23   :  { %v4405_v29 = vpack.c.bf16 %v405_v28, %v404_v27 }
  0x24   :  { %v273_v33 = vrot.slane %v272_v31, 2  ;;  %v302_v34 = vrot.slane %v301_v32, 2 }
  0x26   :  { %v274_v35 = vadd.f32 %v273_v33, %v272_v31  ;;  %v303_v36 = vadd.f32 %v302_v34, %v301_v32  ;;  %v407_v31 = vld [vmem:[%s4882_s29 + $0x38] sm:$0xff]  ;;  %v408_v33 = vld [vmem:[%s4882_s29 + $0x40] sm:$0xff]  ;;  %v409_v34 = vld [vmem:[%s4882_s29 + $0x48] sm:$0xff] }
  0x27   :  { %v4409_v32 = vpack.c.bf16 %v407_v31, %v406_v30 }
  0x28   :  { %v275_v37 = vrot.slane %v274_v35, 1  ;;  %v304_v38 = vrot.slane %v303_v36, 1 }
  0x2a   :  { %v276_v39 = vadd.f32 %v275_v37, %v274_v35  ;;  %v305_v40 = vadd.f32 %v304_v38, %v303_v36  ;;  %v4413_v35 = vpack.c.bf16 %v409_v34, %v408_v33  ;;  %v410_v36 = vld [vmem:[%s4882_s29 + $0x50] sm:$0xff]  ;;  %v411_v37 = vld [vmem:[%s4882_s29 + $0x58] sm:$0xff] }
  0x2b   :  { %v4417_v38 = vpack.c.bf16 %v411_v37, %v410_v36  ;;  %v3710_v37 = vld [vmem:[%s3665_s19] ss:$0 sm:$0xff]  ;;  %s5128_s19 = sld [smem:[%s5278_s0 + %s4812_s16]]   ;;  %s4830_s16 = smov 41  }
  0x2c   :  { %v278_v41 = vmul.f32 0.14285715, %v276_v39  ;;  %v306_v42 = vmul.f32 0.14285715, %v305_v40  ;;  %v412_v39 = vld [vmem:[%s4882_s29 + $0x60] sm:$0xff]  ;;  %v413_v40 = vld [vmem:[%s4882_s29 + $0x68] sm:$0xff] }
  0x2e   :  { %4702 = vrsqrt.f32 %v278_v41  ;;  %vm281_vm1 = vcmp.eq.f32.partialorder %v278_v41, inf  ;;  %v284_v44 = vand.u32 2147483648, %v278_v41  ;;  %vm283_vm2 = vcmp.eq.f32.partialorder %v278_v41, 0.0 }
  0x2f   :  { %4704 = vrsqrt.f32 %v306_v42  ;;  %vm309_vm3 = vcmp.eq.f32.partialorder %v306_v42, inf  ;;  %v312_v47 = vand.u32 2147483648, %v306_v42  ;;  %vm311_vm4 = vcmp.eq.f32.partialorder %v306_v42, 0.0 }
  0x38   :  { %v4703_v43 = vpop.eup %4702 }
  0x39   :  { %v4705_v45 = vpop.eup %4704  ;;  %v280_v46 = vmul.f32 %v4703_v43, %v278_v41  ;;  %v415_v43 = vld [vmem:[%s4882_s29 + $0x78] sm:$0xff] }
  0x3a   :  { %v308_v48 = vmul.f32 %v4705_v45, %v306_v42 }
  0x3b   :  { %v282_v49 = vsel %vm281_vm1, %v278_v41, %v280_v46  ;;  %v4421_v41 = vpack.c.bf16 %v413_v40, %v412_v39  ;;  %v3703_v39 = vld [vmem:[%s3658_s23] ss:$0 sm:$0xff]  ;;  %s3682_s23 = sld [smem:[%s5278_s0 + %s4813_s20]]   ;;  %s4831_s20 = smov 44  }
  0x3c   :  { %v285_v50 = vsel %vm283_vm2, %v284_v44, %v282_v49  ;;  %v310_v51 = vsel %vm309_vm3, %v306_v42, %v308_v48  ;;  %v414_v42 = vld [vmem:[%s4882_s29 + $0x70] sm:$0xff] }
  0x3d   :  { %v286_v52 = vadd.f32 1e-06, %v285_v50  ;;  %v313_v53 = vsel %vm311_vm4, %v312_v47, %v310_v51  ;;  %v4425_v44 = vpack.c.bf16 %v415_v43, %v414_v42 }
  0x3e   :  { %v314_v54 = vadd.f32 1e-06, %v313_v53 }
  0x3f   :  { %4706 = vrcp.f32 %v286_v52 }
  0x40   :  { %4708 = vrcp.f32 %v314_v54 }
  0x49   :  { %v4707_v55 = vpop.eup %4706 }
  0x4a   :  { %v4709_v56 = vpop.eup %4708  ;;  %v288_v57 = vmul.f32 %v4707_v55, %v268_v23  ;;  %v4397_v23 = vpack.c.bf16 %v401_v22, %v400_v21  ;;  %v505_v21 = vld [vmem:[%s4923_s11 + $0x18] sm:$0xff] }
  0x4b   :  { %v316_v58 = vmul.f32 %v4709_v56, %v297_v24  ;;  %v402_v24 = vld [vmem:[%s4882_s29 + $0x10] sm:$0xff]  ;;  %s3675_s29 = sld [smem:[%s5278_s0 + %s4807_s26]]   ;;  %s4825_s26 = smov 37  }
  0x4c   :  { %320 = vperm.xlu0 %4701, %v288_v57   ;;  %v4401_v26 = vpack.c.bf16 %v403_v25, %v402_v24  ;;  %4398 = vmatprep.subr.bf16.mxu0 %v4397_v23  ;;  %v3715_v24 = vld [vmem:[%s4923_s11 + $0x48] sm:$0xff] }
  0x4d   :  { %4400 = vmatpush3.bf16.msra.mxu0 %v4397_v23  ;;  %v3714_v23 = vld [vmem:[%s4923_s11 + $0x40] sm:$0xff] }
  0x4e   :  { %4402 = vmatprep.subr.bf16.mxu0 %v4401_v26  ;;  %v4437_v25 = vpack.c.bf16 %v3715_v24, %v3714_v23 }
  0x50   :  { %325 = vperm.xlu0 %4701, %v316_v58  }
  0x51   :  { %4404 = vmatpush3.bf16.msra.mxu0 %v4401_v26 }
  0x52   :  { %4406 = vmatprep.subr.bf16.mxu0 %v4405_v29 }
  0x55   :  { %4408 = vmatpush3.bf16.msra.mxu0 %v4405_v29 }
  0x56   :  { %4410 = vmatprep.subr.bf16.mxu0 %v4409_v32 }
  0x59   :  { %4412 = vmatpush3.bf16.msra.mxu0 %v4409_v32 }
  0x5a   :  { %4414 = vmatprep.subr.bf16.mxu0 %v4413_v35 }
  0x5d   :  { %4416 = vmatpush3.bf16.msra.mxu0 %v4413_v35  ;;  %v3702_v35 = vld [vmem:[%s3657_s15] ss:$0 sm:$0xff]  ;;  %s3679_s15 = sld [smem:[%s5278_s0 + %s4811_s12]]   ;;  %s4829_s12 = smov 39  }
  0x5e   :  { %4418 = vmatprep.subr.bf16.mxu0 %v4417_v38 }
  0x61   :  { %4420 = vmatpush3.bf16.msra.mxu0 %v4417_v38 }
  0x62   :  { %4422 = vmatprep.subr.bf16.mxu0 %v4421_v41 }
  0x65   :  { %4424 = vmatpush3.bf16.msra.mxu0 %v4421_v41 }
  0x66   :  { %4426 = vmatprep.subr.bf16.mxu0 %v4425_v44 }
  0x69   :  { %4428 = vmatpush3.bf16.msra.mxu0 %v4425_v44 }
  0xcb   :  { %v321_v60 = vpop.permute.xlu0 %320 }
  0xcc   :  { %v334_v62 = vmul.f32 %v3704_v59, %v321_v60  ;;  %v3706_v60 = vld [vmem:[%s3662_s3] ss:$0 sm:$0xff]  ;;  %s3677_s3 = sld [smem:[%s5278_s0 + %s4808_s30]]   ;;  %s4826_s30 = smov 38  }
  0xce   :  { %v343_v63 = vadd.f32 %v3705_v61, %v334_v62 }
  0xcf   :  { %v326_v0 = vpop.permute.xlu0 %325 }
  0xd0   :  { %v335_v1 = vmul.f32 %v3704_v59, %v326_v0  ;;  %347 = vadd.xlane.f32.xlu1 %v343_v63 }
  0xd2   :  { %v344_v2 = vadd.f32 %v3705_v61, %v335_v1 }
  0xd4   :  { %349 = vadd.xlane.f32.xlu1 %v344_v2 }
 0x15d   :  { %v348_v3 = vpop.xlane.xlu1 %347 }
 0x15e   :  { %v352_v4 = vmul.f32 0.0078125, %v348_v3 }
 0x160   :  { %v4863_v7 = vsub.f32 %v343_v63, %v352_v4  ;;  %v3707_v63 = vld [vmem:[%s3663_s7] ss:$0 sm:$0xff]  ;;  %s5089_s7 = sld [smem:[%s5278_s0 + %s4809_s4]]   ;;  %s4827_s4 = smov 13  }
 0x161   :  { %v350_v8 = vpop.xlane.xlu1 %349 }
 0x162   :  { %v353_v10 = vmul.f32 0.0078125, %v350_v8  ;;  %v356_v11 = vmul.f32 %v4863_v7, %v4863_v7 }
 0x164   :  { %v4867_v14 = vsub.f32 %v344_v2, %v353_v10  ;;  %358 = vadd.xlane.f32.xlu0 %v356_v11 }
 0x166   :  { %v357_v17 = vmul.f32 %v4867_v14, %v4867_v14 }
 0x168   :  { %360 = vadd.xlane.f32.xlu1 %v357_v17 }
 0x16c   :  { %210 = vadd.xlane.f32.xlu1 %v209_v18 }
 0x170   :  { %213 = vadd.xlane.f32.xlu1 %v212_v20  ;;  %v504_v20 = vld [vmem:[%s4923_s11 + $0x10] sm:$0xff] }
 0x171   :  { %v4433_v22 = vpack.c.bf16 %v505_v21, %v504_v20  ;;  %v3754_v21 = vld [vmem:[%s4923_s11 + $0xb0] sm:$0xff] }
 0x1f1   :  { %v359_v45 = vpop.xlane.xlu0 %358 }
 0x1f2   :  { %v362_v46 = vmul.f32 0.0078125, %v359_v45 }
 0x1f4   :  { %v364_v47 = vadd.f32 1e-05, %v362_v46  ;;  %v3716_v46 = vld [vmem:[%s4923_s11 + $0x50] sm:$0xff] }
 0x1f5   :  { %v361_v48 = vpop.xlane.xlu1 %360 }
 0x1f6   :  { %4710 = vrsqrt.f32 %v364_v47  ;;  %v363_v49 = vmul.f32 0.0078125, %v361_v48  ;;  %v3717_v47 = vld [vmem:[%s4923_s11 + $0x58] sm:$0xff] }
 0x1f8   :  { %v365_v50 = vadd.f32 1e-05, %v363_v49 }
 0x1f9   :  { %v211_v51 = vpop.xlane.xlu1 %210 }
 0x1fa   :  { %4712 = vrsqrt.f32 %v365_v50  ;;  %v216_v52 = vmul.f32 0.03125, %v211_v51  ;;  %v4441_v51 = vpack.c.bf16 %v3717_v47, %v3716_v46 }
 0x1fc   :  { %v4907_v53 = vsub.f32 %v4869_v15, %v216_v52  ;;  %v3722_v52 = vld [vmem:[%s4923_s11 + $0x80] sm:$0xff] }
 0x1fd   :  { %v214_v54 = vpop.xlane.xlu1 %213 }
 0x1fe   :  { %v217_v55 = vmul.f32 0.03125, %v214_v54  ;;  %v220_v56 = vmul.f32 %v4907_v53, %v4907_v53 }
 0x200   :  { %v4711_v57 = vpop.eup %4710  ;;  %v4912_v58 = vsub.f32 %v4875_v19, %v217_v55  ;;  %v222_v59 = vsel %vm208_vm5, %v220_v56, 0.0  ;;  %v3724_v55 = vld [vmem:[%s4923_s11 + $0x90] sm:$0xff]  ;;  %v3725_v56 = vld [vmem:[%s4923_s11 + $0x98] sm:$0xff] }
 0x201   :  { %223 = vadd.xlane.f32.xlu1 %v222_v59  ;;  %v368_v61 = vmul.f32 %v4711_v57, %v4863_v7  ;;  %v4449_v57 = vpack.c.bf16 %v3725_v56, %v3724_v55  ;;  %v3744_v56 = vld [vmem:[%s4923_s11 + $0x60] sm:$0xff] }
 0x202   :  { %v221_v62 = vmul.f32 %v4912_v58, %v4912_v58 }
 0x203   :  { %v376_v0 = vmul.f32 %v3706_v60, %v368_v61 }
 0x204   :  { %v4713_v1 = vpop.eup %4712  ;;  %v225_v2 = vsel %vm208_vm5, %v221_v62, 0.0  ;;  %v3719_v62 = vld [vmem:[%s4967_s27 + $0x2] ss:$0 sm:$0xff] }
 0x205   :  { %226 = vadd.xlane.f32.xlu1 %v225_v2  ;;  %v369_v3 = vmul.f32 %v4713_v1, %v4867_v14  ;;  %v384_v4 = vadd.f32 %v3707_v63, %v376_v0  ;;  %v503_v14 = vld [vmem:[%s4923_s11 + $0x8] sm:$0xff]  ;;  %v3736_v2 = vld [vmem:[%s4923_s11 + $0x20] sm:$0xff] }
 0x206   :  { %v4429_v15 = vpack.c.bf16 %v503_v14, %v502_v13  ;;  %v3739_v13 = vld [vmem:[%s4923_s11 + $0x38] sm:$0xff] }
 0x207   :  { %v377_v5 = vmul.f32 %v3706_v60, %v369_v3  ;;  %v3708_v6 = vmul.f32 -1.442695, %v384_v4  ;;  %v3737_v3 = vld [vmem:[%s4923_s11 + $0x28] sm:$0xff] }
 0x208   :  { %4430 = vmatprep.subr.bf16.mxu1 %v4429_v15 }
 0x209   :  { %v385_v8 = vadd.f32 %v3707_v63, %v377_v5  ;;  %4714 = vpow2.f32 %v3708_v6  ;;  %4432 = vmatpush3.bf16.msra.mxu1 %v4429_v15 }
 0x20a   :  { %4434 = vmatprep.subr.bf16.mxu1 %v4433_v22 }
 0x20b   :  { %v3709_v9 = vmul.f32 -1.442695, %v385_v8 }
 0x20d   :  { %4716 = vpow2.f32 %v3709_v9  ;;  %4436 = vmatpush3.bf16.msra.mxu1 %v4433_v22  ;;  %v3727_v9 = vld [vmem:[%s4967_s27 + $0x4] ss:$0 sm:$0xff]  ;;  %v3755_v22 = vld [vmem:[%s4923_s11 + $0xb8] sm:$0xff] }
 0x20e   :  { %4438 = vmatprep.subr.bf16.mxu1 %v4437_v25  ;;  %v4483_v23 = vpack.c.bf16 %v3755_v22, %v3754_v21 }
 0x213   :  { %v4715_v10 = vpop.eup %4714 }
 0x214   :  { %v392_v7 = vadd.f32 1.0, %v4715_v10 }
 0x216   :  { %4718 = vrcp.f32 %v392_v7 }
 0x217   :  { %v4717_v11 = vpop.eup %4716 }
 0x218   :  { %v393_v12 = vadd.f32 1.0, %v4717_v11 }
 0x21a   :  { %4720 = vrcp.f32 %v393_v12  ;;  %v3738_v12 = vld [vmem:[%s4923_s11 + $0x30] sm:$0xff] }
 0x220   :  { %v4719_v16 = vpop.eup %4718 }
 0x221   :  { %v398_v17 = vmul.f32 %v4719_v16, %v384_v4 }
 0x223   :  { %4082 = vmatprep.mubr.f32.mxu0 %v398_v17  ;;  %v4467_v17 = vpack.c.bf16 %v3739_v13, %v3738_v12 }
 0x224   :  { %v4721_v18 = vpop.eup %4720 }
 0x225   :  { %v399_v19 = vmul.f32 %v4721_v18, %v385_v8  ;;  %v4463_v8 = vpack.c.bf16 %v3737_v3, %v3736_v2  ;;  %v3752_v18 = vld [vmem:[%s4923_s11 + $0xa0] sm:$0xff] }
 0x227   :  { %4083 = vmatmul.mubr.f32.vlgmr.msra.gmra.mrb[0].mxu0 %v399_v19  ;;  %v3753_v19 = vld [vmem:[%s4923_s11 + $0xa8] sm:$0xff] }
 0x228   :  { %v4479_v20 = vpack.c.bf16 %v3753_v19, %v3752_v18 }
 0x28e   :  { %v224_v26 = vpop.xlane.xlu1 %223 }
 0x28f   :  { %v228_v28 = vmul.f32 0.03125, %v224_v26  ;;  %v5003_v26 = vld [vmem:[%s3666_s1] sm:$0xff] }
 0x291   :  { %v230_v30 = vadd.f32 1e-12, %v228_v28 }
 0x292   :  { %v227_v27 = vpop.xlane.xlu1 %226 }
 0x293   :  { %v229_v29 = vmul.f32 0.03125, %v227_v27  ;;  %4722 = vrsqrt.f32 %v230_v30 }
 0x295   :  { %v231_v31 = vadd.f32 1e-12, %v229_v29  ;;  %v5005_v29 = vld [vmem:[%s3666_s1 + $0x8] sm:$0xff]  ;;  %s3686_s1 = sld [smem:[%s5278_s0 + %s4815_s28]]   ;;  %s4833_s28 = smov 42  }
 0x297   :  { %4724 = vrsqrt.f32 %v231_v31 }
 0x29d   :  { %v4723_v32 = vpop.eup %4722 }
 0x29e   :  { %v234_v34 = vmul.f32 %v4723_v32, %v4907_v53  ;;  %v3723_v53 = vld [vmem:[%s4923_s11 + $0x88] sm:$0xff]  ;;  %v3741_v32 = vld [vmem:[%s4967_s27 + $0x1] ss:$0 sm:$0xff] }
 0x29f   :  { %v4445_v54 = vpack.c.bf16 %v3723_v53, %v3722_v52 }
 0x2a0   :  { %v242_v38 = vmul.f32 %v3702_v35, %v234_v34 }
 0x2a1   :  { %v4725_v33 = vpop.eup %4724 }
 0x2a2   :  { %v235_v36 = vmul.f32 %v4725_v33, %v4912_v58  ;;  %v250_v44 = vadd.f32 %v3703_v39, %v242_v38  ;;  %v3711_v58 = vld [vmem:[%s4967_s27] ss:$0 sm:$0xff]  ;;  %v3757_v38 = vld [vmem:[%s4967_s27 + $0x5] ss:$0 sm:$0xff] }
 0x2a4   :  { %v243_v40 = vmul.f32 %v3702_v35, %v235_v36 }
 0x2a6   :  { %v251_v48 = vadd.f32 %v3703_v39, %v243_v40 }
 0x2fa   :  { %v4084_v41 = vpop.f32.mrb[0].mxu0 }
 0x2fb   :  { %v495_v42 = vadd.f32 %v4084_v41, %v3710_v37  ;;  %v489_v43 = vpop.f32.mrb[1].mxu0 }
 0x2fc   :  { %v490_v45 = vadd.f32 %v3710_v37, %v489_v43 }
 0x2fd   :  { %v4946_v50 = vadd.f32 %v495_v42, %v251_v48 }
 0x2fe   :  { %v4944_v49 = vadd.f32 %v490_v45, %v250_v44 }
 0x300   :  { %4093 = vmatprep.mubr.msk.f32.mxu1 %vm208_vm5, %v4944_v49 }
 0x301   :  { %4094 = vmatmul.mubr.msk.f32.vlgmr.msra.gmra.mrb[0].mxu1 %vm208_vm5, %v4946_v50 }
 0x302   :  { %4440 = vmatpush3.bf16.msra.mxu1 %v4437_v25  ;;  %4104 = vmatprep.mubr.msk.f32.mxu1 %vm208_vm5, %v4944_v49 }
 0x303   :  { %4442 = vmatprep.subr.bf16.mxu1 %v4441_v51 }
 0x306   :  { %4444 = vmatpush3.bf16.msra.mxu1 %v4441_v51 }
 0x307   :  { %4446 = vmatprep.subr.bf16.mxu1 %v4445_v54 }
 0x309   :  { %4105 = vmatmul.mubr.msk.f32.vlgmr.msra.gmra.mrb[2].mxu1 %vm208_vm5, %v4946_v50 }
 0x30a   :  { %4448 = vmatpush3.bf16.msra.mxu1 %v4445_v54  ;;  %4115 = vmatprep.mubr.msk.f32.mxu1 %vm208_vm5, %v4944_v49 }
 0x30b   :  { %4450 = vmatprep.subr.bf16.mxu1 %v4449_v57 }
 0x30e   :  { %4452 = vmatpush3.bf16.msra.mxu1 %v4449_v57  ;;  %v3745_v57 = vld [vmem:[%s4923_s11 + $0x68] sm:$0xff] }
 0x311   :  { %4116 = vmatmul.mubr.msk.f32.vlgmr.msra.gmra.mrb[4].mxu1 %vm208_vm5, %v4946_v50 }
 0x3d4   :  { %v4095_v59 = vpop.f32.mrb[0].mxu1 }
 0x3d5   :  { %v585_v60 = vpop.f32.mrb[1].mxu1  ;;  %v591_v15 = vadd.f32 %v4095_v59, %v3711_v58 }
 0x3d6   :  { %v586_v61 = vadd.f32 %v3711_v58, %v585_v60  ;;  %v4471_v58 = vpack.c.bf16 %v3745_v57, %v3744_v56 }
 0x3d8   :  { %4122 = vmatprep.mubr.msk.f32.mxu1 %vm770_vm6, %v586_v61 }
 0x3dc   :  { %v4106_v63 = vpop.f32.mrb[2].mxu1 }
 0x3dd   :  { %v679_v0 = vadd.f32 %v4106_v63, %v3719_v62  ;;  %v673_v1 = vpop.f32.mrb[3].mxu1  ;;  %v3746_v63 = vld [vmem:[%s4923_s11 + $0x70] sm:$0xff] }
 0x3de   :  { %v674_v4 = vadd.f32 %v3719_v62, %v673_v1 }
 0x3e0   :  { %v4453_v6 = vpack.c.bf16 %v679_v0, %v674_v4  ;;  %v3747_v0 = vld [vmem:[%s4923_s11 + $0x78] sm:$0xff]  ;;  %s3678_s11 = sld [smem:[%s5278_s0 + %s4810_s8]]   ;;  %s4828_s8 = smov 40  }
 0x3e1   :  { %v4475_v3 = vpack.c.bf16 %v3747_v0, %v3746_v63 }
 0x3e2   :  { %4455 = vmatprep.subr.msk.bf16.mxu1 %vm4976_vm7, %v4453_v6 }
 0x3e3   :  { %4458 = vmatpush3.bf16.xpose.msk.msra.mxu1 %vm4976_vm7, %v4453_v6 }
 0x3e4   :  { %v4117_v10 = vpop.f32.mrb[4].mxu1  ;;  %4464 = vmatprep.subr.bf16.mxu1 %v4463_v8 }
 0x3e5   :  { %v767_v7 = vadd.f32 %v4117_v10, %v3727_v9  ;;  %v761_v11 = vpop.f32.mrb[5].mxu1 }
 0x3e6   :  { %v762_v14 = vadd.f32 %v3727_v9, %v761_v11  ;;  %v3749_v9 = vld [vmem:[%s4967_s27 + $0x3] ss:$0 sm:$0xff]  ;;  %s3683_s27 = sld [smem:[%s5278_s0 + %s4814_s24]]   ;;  %s4832_s24 = smov 45  }
 0x3e8   :  { %v4459_v16 = vpack.c.bf16 %v767_v7, %v762_v14 }
 0x3ea   :  { %4123 = vmatmul.mubr.msk.f32.vlgmr.msra.gmra.mrb[6].mxu1 %vm770_vm6, %v591_v15  ;;  %4460 = vmatprep.subr.bf16.mxu0 %v4459_v16 }
 0x3eb   :  { %4462 = vmatpush3.bf16.msra.mxu0 %v4459_v16  ;;  %4466 = vmatpush3.bf16.msra.mxu1 %v4463_v8 }
 0x3ec   :  { %4140 = vmatprep.mubr.msk.f32.mxu1 %vm208_vm5, %v4944_v49  ;;  %4468 = vmatprep.subr.bf16.mxu1 %v4467_v17 }
 0x3ed   :  { %4472 = vmatprep.subr.bf16.mxu0 %v4471_v58 }
 0x3ef   :  { %4470 = vmatpush3.bf16.msra.mxu1 %v4467_v17 }
 0x3f0   :  { %4480 = vmatprep.subr.bf16.mxu1 %v4479_v20 }
 0x3f2   :  { %4141 = vmatmul.mubr.msk.f32.vlgmr.msra.gmra.mrb[8].mxu1 %vm208_vm5, %v4946_v50 }
 0x3f3   :  { %4482 = vmatpush3.bf16.msra.mxu1 %v4479_v20  ;;  %4162 = vmatprep.mubr.msk.f32.mxu1 %vm208_vm5, %v4944_v49 }
 0x3f4   :  { %4484 = vmatprep.subr.bf16.mxu1 %v4483_v23 }
 0x3f7   :  { %4486 = vmatpush3.bf16.msra.mxu1 %v4483_v23 }
 0x3fa   :  { %4163 = vmatmul.mubr.msk.f32.vlgmr.msra.gmra.mrb[10].mxu1 %vm208_vm5, %v4946_v50 }
 0x4bd   :  { %v4124_v24 = vpop.f32.mrb[6].mxu1 }
 0x4be   :  { %v849_v25 = vpop.f32.mrb[7].mxu1  ;;  %v859_v27 = vmul.f32 0.25, %v4124_v24 }
 0x4bf   :  { %v858_v28 = vmul.f32 0.25, %v849_v25 }
 0x4c0   :  { %v861_v33 = vadd.f32 %v859_v27, %v5005_v29 }
 0x4c1   :  { %v860_v30 = vadd.f32 %v858_v28, %v5003_v26 }
 0x4c2   :  { %v865_v37 = vsel %vm770_vm6, %v861_v33, -inf }
 0x4c3   :  { %v862_v31 = vsel %vm770_vm6, %v860_v30, -inf }
 0x4c4   :  { %863 = vmax.xlane.f32.xlu1 %v862_v31 }
 0x4c5   :  { %v4142_v34 = vpop.f32.mrb[8].mxu1 }
 0x4c6   :  { %v1052_v35 = vadd.f32 %v4142_v34, %v3741_v32  ;;  %v1046_v36 = vpop.f32.mrb[9].mxu1  ;;  %v3766_v34 = vld [vmem:[%s3670_s5 + $0x10] sm:$0xff] }
 0x4c7   :  { %v1047_v4 = vadd.f32 %v3741_v32, %v1046_v36 }
 0x4c8   :  { %866 = vmax.xlane.f32.xlu1 %v865_v37 }
 0x4cd   :  { %v4164_v39 = vpop.f32.mrb[10].mxu1 }
 0x4ce   :  { %v1228_v40 = vadd.f32 %v4164_v39, %v3757_v38  ;;  %v1222_v41 = vpop.f32.mrb[11].mxu1 }
 0x4cf   :  { %v1223_v42 = vadd.f32 %v3757_v38, %v1222_v41 }
 0x4d1   :  { %v4493_v43 = vpack.c.bf16 %v1228_v40, %v1223_v42 }
 0x4d3   :  { %4494 = vmatprep.subr.bf16.mxu1 %v4493_v43 }
 0x4d4   :  { %4496 = vmatpush3.bf16.msra.mxu1 %v4493_v43  ;;  %v965_v43 = vld [vmem:[%s3670_s5] sm:$0xff] }
 0x551   :  { %v864_v44 = vpop.xlane.xlu1 %863 }
 0x552   :  { %v868_v45 = vsub.f32 %v860_v30, %v864_v44  ;;  %v966_v44 = vld [vmem:[%s3670_s5 + $0x8] sm:$0xff] }
 0x554   :  { %v870_v46 = vmul.f32 1.442695, %v868_v45  ;;  %v4501_v45 = vpack.c.bf16 %v966_v44, %v965_v43 }
 0x555   :  { %v867_v47 = vpop.xlane.xlu1 %866 }
 0x556   :  { %4726 = vpow2.f32 %v870_v46  ;;  %v869_v48 = vsub.f32 %v861_v33, %v867_v47 }
 0x558   :  { %v872_v51 = vmul.f32 1.442695, %v869_v48  ;;  %v3772_v48 = vld [vmem:[%s3671_s9] ss:$0 sm:$0xff]  ;;  %s3685_s9 = sld [smem:[%s5278_s0 + %s4817_s6]]   ;;  %s4835_s6 = smov 46  }
 0x55a   :  { %4728 = vpow2.f32 %v872_v51 }
 0x560   :  { %v4727_v52 = vpop.eup %4726 }
 0x561   :  { %v874_v53 = vsel %vm770_vm6, %v4727_v52, 0.0 }
 0x562   :  { %875 = vadd.xlane.f32.xlu1 %v874_v53 }
 0x564   :  { %v4729_v54 = vpop.eup %4728 }
 0x565   :  { %v877_v55 = vsel %vm770_vm6, %v4729_v54, 0.0 }
 0x566   :  { %878 = vadd.xlane.f32.xlu0 %v877_v55 }
 0x5ef   :  { %v876_v59 = vpop.xlane.xlu1 %875 }
 0x5f0   :  { %4730 = vrcp.f32 %v876_v59 }
 0x5f3   :  { %v879_v60 = vpop.xlane.xlu0 %878 }
 0x5f4   :  { %4732 = vrcp.f32 %v879_v60 }
 0x5fa   :  { %v4731_v61 = vpop.eup %4730 }
 0x5fb   :  { %v882_v62 = vmul.f32 %v4731_v61, %v4727_v52 }
 0x5fd   :  { %4129 = vmatprep.mubr.msk.f32.mxu0 %vm770_vm6, %v882_v62 }
 0x5fe   :  { %v4733_v1 = vpop.eup %4732 }
 0x5ff   :  { %v883_v2 = vmul.f32 %v4733_v1, %v4729_v54 }
 0x601   :  { %4130 = vmatmul.mubr.msk.f32.vlgmr.msra.gmra.mrb[2].mxu0 %vm770_vm6, %v883_v2 }
 0x602   :  { %4474 = vmatpush3.bf16.msra.mxu0 %v4471_v58  ;;  %4151 = vmatprep.mubr.msk.f32.mxu0 %vm208_vm5, %v4944_v49 }
 0x603   :  { %4476 = vmatprep.subr.bf16.mxu0 %v4475_v3 }
 0x606   :  { %4478 = vmatpush3.bf16.msra.mxu0 %v4475_v3 }
 0x609   :  { %4152 = vmatmul.mubr.msk.f32.vlgmr.msra.gmra.mrb[4].mxu0 %vm208_vm5, %v4946_v50 }
 0x60a   :  { %4169 = vmatprep.mubr.msk.f32.mxu0 %vm770_vm6, %v1047_v4  ;;  %v1646_v4 = vld [vmem:[%s3674_s13 + $0x8] sm:$0xff] }
 0x6d4   :  { %v4131_v6 = vpop.f32.mrb[2].mxu0 }
 0x6d5   :  { %v956_v8 = vpop.f32.mrb[3].mxu0 }
 0x6dc   :  { %v4153_v10 = vpop.f32.mrb[4].mxu0 }
 0x6dd   :  { %v1140_v7 = vadd.f32 %v4153_v10, %v3749_v9  ;;  %v1134_v11 = vpop.f32.mrb[5].mxu0 }
 0x6de   :  { %v1135_v12 = vadd.f32 %v3749_v9, %v1134_v11  ;;  %v1648_v9 = vld [vmem:[%s3674_s13 + $0x18] sm:$0xff] }
 0x6e0   :  { %v4487_v13 = vpack.c.bf16 %v1140_v7, %v1135_v12 }
 0x6e2   :  { %4489 = vmatprep.subr.msk.bf16.mxu0 %vm4976_vm7, %v4487_v13 }
 0x6e3   :  { %4492 = vmatpush3.bf16.xpose.msk.msra.mxu0 %vm4976_vm7, %v4487_v13 }
 0x6ea   :  { %4170 = vmatmul.mubr.msk.f32.vlgmr.msra.gmra.mrb[6].mxu0 %vm770_vm6, %v1052_v35  ;;  %v3767_v35 = vld [vmem:[%s3670_s5 + $0x18] sm:$0xff]  ;;  %s3684_s5 = sld [smem:[%s5278_s0 + %s4816_s2]]   ;;  %s4834_s2 = smov 43  }
 0x6eb   :  { %v4497_v36 = vpack.c.bf16 %v3767_v35, %v3766_v34  ;;  %v1759_v34 = vld [vmem:[%s3676_s25 + $0x20] sm:$0xff]  ;;  %v1760_v35 = vld [vmem:[%s3676_s25 + $0x28] sm:$0xff] }
 0x6ed   :  { %4498 = vmatprep.subr.bf16.mxu0 %v4497_v36 }
 0x6ee   :  { %4500 = vmatpush3.bf16.msra.mxu0 %v4497_v36  ;;  %v4521_v36 = vpack.c.bf16 %v1760_v35, %v1759_v34  ;;  %v3787_v34 = vld [vmem:[%s5089_s7 + $0x48] sm:$0xff] }
 0x6ef   :  { %4502 = vmatprep.subr.bf16.mxu0 %v4501_v45 }
 0x7bd   :  { %v4171_v14 = vpop.f32.mrb[6].mxu0 }
 0x7be   :  { %v1319_v15 = vmul.f32 0.25, %v4171_v14  ;;  %v1309_v16 = vpop.f32.mrb[7].mxu0 }
 0x7bf   :  { %v1318_v17 = vmul.f32 0.25, %v1309_v16 }
 0x7c0   :  { %v1321_v18 = vadd.f32 %v1319_v15, %v5005_v29 }
 0x7c1   :  { %v1320_v19 = vadd.f32 %v1318_v17, %v5003_v26  ;;  %v3773_v17 = vld [vmem:[%s3672_s17] ss:$0 sm:$0xff]  ;;  %s3687_s17 = sld [smem:[%s5278_s0 + %s4819_s14]]  }
 0x7c2   :  { %v1325_v20 = vsel %vm770_vm6, %v1321_v18, -inf }
 0x7c3   :  { %1326 = vmax.xlane.f32.xlu0 %v1325_v20  ;;  %v1322_v21 = vsel %vm770_vm6, %v1320_v19, -inf }
 0x7c4   :  { %1323 = vmax.xlane.f32.xlu1 %v1322_v21  ;;  %v3774_v21 = vld [vmem:[%s3673_s21] ss:$0 sm:$0xff]  ;;  %s3689_s21 = sld [smem:[%s5278_s0 + %s4820_s18]]  }
 0x850   :  { %v1327_v22 = vpop.xlane.xlu0 %1326 }
 0x851   :  { %v1329_v23 = vsub.f32 %v1321_v18, %v1327_v22  ;;  %v1324_v24 = vpop.xlane.xlu1 %1323 }
 0x852   :  { %v1328_v25 = vsub.f32 %v1320_v19, %v1324_v24 }
 0x853   :  { %v1332_v27 = vmul.f32 1.442695, %v1329_v23 }
 0x854   :  { %v1330_v28 = vmul.f32 1.442695, %v1328_v25 }
 0x855   :  { %4734 = vpow2.f32 %v1332_v27  ;;  %v1755_v27 = vld [vmem:[%s3676_s25] sm:$0xff] }
 0x856   :  { %4736 = vpow2.f32 %v1330_v28  ;;  %v1756_v28 = vld [vmem:[%s3676_s25 + $0x8] sm:$0xff] }
 0x85f   :  { %v4735_v30 = vpop.eup %4734 }
 0x860   :  { %v4737_v31 = vpop.eup %4736  ;;  %v1337_v32 = vsel %vm770_vm6, %v4735_v30, 0.0 }
 0x861   :  { %1338 = vadd.xlane.f32.xlu0 %v1337_v32  ;;  %v1334_v33 = vsel %vm770_vm6, %v4737_v31, 0.0  ;;  %v1758_v32 = vld [vmem:[%s3676_s25 + $0x18] sm:$0xff] }
 0x862   :  { %1335 = vadd.xlane.f32.xlu1 %v1334_v33 }
 0x8ee   :  { %v1339_v37 = vpop.xlane.xlu0 %1338 }
 0x8ef   :  { %4738 = vrcp.f32 %v1339_v37  ;;  %v1336_v38 = vpop.xlane.xlu1 %1335  ;;  %v1761_v37 = vld [vmem:[%s3676_s25 + $0x30] sm:$0xff] }
 0x8f0   :  { %4740 = vrcp.f32 %v1336_v38  ;;  %v1762_v38 = vld [vmem:[%s3676_s25 + $0x38] sm:$0xff] }
 0x8f9   :  { %v4739_v39 = vpop.eup %4738 }
 0x8fa   :  { %v4741_v40 = vpop.eup %4740  ;;  %v1343_v42 = vmul.f32 %v4739_v39, %v4735_v30  ;;  %v4513_v30 = vpack.c.bf16 %v1756_v28, %v1755_v27  ;;  %v4525_v39 = vpack.c.bf16 %v1762_v38, %v1761_v37  ;;  %v1901_v27 = vld [vmem:[%s5089_s7 + $0x18] sm:$0xff] }
 0x8fb   :  { %v1342_v41 = vmul.f32 %v4741_v40, %v4737_v31  ;;  %v1757_v31 = vld [vmem:[%s3676_s25 + $0x10] sm:$0xff]  ;;  %v3775_v40 = vld [vmem:[%s3675_s29] ss:$0 sm:$0xff]  ;;  %s3690_s25 = sld [smem:[%s5278_s0 + %s4824_s22]]  }
 0x8fc   :  { %v4517_v33 = vpack.c.bf16 %v1758_v32, %v1757_v31  ;;  %v3797_v31 = vld [vmem:[%s5089_s7 + $0x98] sm:$0xff]  ;;  %s3691_s29 = sld [smem:[%s5278_s0 + %s4825_s26]]  }
 0x8fd   :  { %4176 = vmatprep.mubr.msk.f32.mxu1 %vm770_vm6, %v1342_v41 }
 0x8fe   :  { %4177 = vmatmul.mubr.msk.f32.vlgmr.msra.gmra.mrb[12].mxu1 %vm770_vm6, %v1343_v42 }
 0x9d1   :  { %v4178_v46 = vpop.f32.mrb[12].mxu1 }
 0x9d2   :  { %v1416_v47 = vpop.f32.mrb[13].mxu1 }
 0x9d3   :  { %4183 = vmatprep.mubr.msk.f32.mxu0 %vm770_vm6, %v1416_v47 }
 0x9d4   :  { %4184 = vmatmul.mubr.msk.f32.vlgmr.msra.gmra.mrb[8].mxu0 %vm770_vm6, %v4178_v46 }
 0x9d5   :  { %4504 = vmatpush3.bf16.msra.mxu0 %v4501_v45  ;;  %4190 = vmatprep.mubr.msk.f32.mxu0 %vm770_vm6, %v956_v8  ;;  %v1647_v8 = vld [vmem:[%s3674_s13 + $0x10] sm:$0xff] }
 0x9d6   :  { %v4509_v10 = vpack.c.bf16 %v1648_v9, %v1647_v8  ;;  %4514 = vmatprep.subr.bf16.mxu0 %v4513_v30 }
 0x9dc   :  { %4191 = vmatmul.mubr.msk.f32.vlgmr.msra.gmra.mrb[8].mxu0 %vm770_vm6, %v4131_v6 }
 0x9dd   :  { %4516 = vmatpush3.bf16.msra.mxu0 %v4513_v30  ;;  %v3796_v30 = vld [vmem:[%s5089_s7 + $0x90] sm:$0xff] }
 0x9de   :  { %4518 = vmatprep.subr.bf16.mxu0 %v4517_v33  ;;  %v4549_v32 = vpack.c.bf16 %v3797_v31, %v3796_v30  ;;  %v3813_v31 = vld [vmem:[%s5128_s19 + $0x1] ss:$0 sm:$0xff] }
 0x9e1   :  { %4520 = vmatpush3.bf16.msra.mxu0 %v4517_v33  ;;  %v3786_v33 = vld [vmem:[%s5089_s7 + $0x40] sm:$0xff] }
 0x9e2   :  { %4522 = vmatprep.subr.bf16.mxu0 %v4521_v36  ;;  %v4537_v35 = vpack.c.bf16 %v3787_v34, %v3786_v33 }
 0x9e5   :  { %4524 = vmatpush3.bf16.msra.mxu0 %v4521_v36 }
 0x9e6   :  { %4526 = vmatprep.subr.bf16.mxu0 %v4525_v39 }
 0x9e9   :  { %4528 = vmatpush3.bf16.msra.mxu0 %v4525_v39 }
 0xaaf   :  { %v4192_v51 = vpop.f32.mrb[8].mxu0 }
 0xab0   :  { %v1598_v52 = vadd.f32 %v4192_v51, %v3772_v48  ;;  %v1581_v53 = vpop.f32.mrb[9].mxu0 }
 0xab1   :  { %v1597_v54 = vadd.f32 %v3772_v48, %v1581_v53 }
 0xab2   :  { %v1600_v55 = vadd.f32 %v1598_v52, %v4946_v50 }
 0xab3   :  { %v1599_v56 = vadd.f32 %v1597_v54, %v4944_v49  ;;  %v1645_v49 = vld [vmem:[%s3674_s13] sm:$0xff]  ;;  %s3688_s13 = sld [smem:[%s5278_s0 + %s4818_s10]]  }
 0xab4   :  { %v1606_v57 = vsel %vm208_vm5, %v1600_v55, 0.0  ;;  %v4505_v6 = vpack.c.bf16 %v1646_v4, %v1645_v49 }
 0xab5   :  { %1607 = vadd.xlane.f32.xlu0 %v1606_v57  ;;  %v1603_v58 = vsel %vm208_vm5, %v1599_v56, 0.0 }
 0xab6   :  { %1604 = vadd.xlane.f32.xlu1 %v1603_v58  ;;  %4506 = vmatprep.subr.bf16.mxu1 %v4505_v6 }
 0xab7   :  { %4508 = vmatpush3.bf16.msra.mxu1 %v4505_v6 }
 0xab8   :  { %4510 = vmatprep.subr.bf16.mxu1 %v4509_v10 }
 0xabb   :  { %4512 = vmatpush3.bf16.msra.mxu1 %v4509_v10 }
 0xb42   :  { %v1608_v59 = vpop.xlane.xlu0 %1607 }
 0xb43   :  { %v1610_v60 = vmul.f32 0.03125, %v1608_v59  ;;  %v1605_v61 = vpop.xlane.xlu1 %1604 }
 0xb44   :  { %v1609_v62 = vmul.f32 0.03125, %v1605_v61 }
 0xb45   :  { %v1612_v63 = vsub.f32 %v1600_v55, %v1610_v60 }
 0xb46   :  { %v1611_v0 = vsub.f32 %v1599_v56, %v1609_v62 }
 0xb47   :  { %v1614_v1 = vmul.f32 %v1612_v63, %v1612_v63 }
 0xb48   :  { %v1613_v2 = vmul.f32 %v1611_v0, %v1611_v0 }
 0xb49   :  { %v1618_v3 = vsel %vm208_vm5, %v1614_v1, 0.0  ;;  %v3778_v1 = vld [vmem:[%s3677_s3] ss:$0 sm:$0xff]  ;;  %s3692_s3 = sld [smem:[%s5278_s0 + %s4826_s30]]  }
 0xb4a   :  { %1619 = vadd.xlane.f32.xlu0 %v1618_v3  ;;  %v1615_v50 = vsel %vm208_vm5, %v1613_v2, 0.0 }
 0xb4b   :  { %1616 = vadd.xlane.f32.xlu1 %v1615_v50 }
 0xbd7   :  { %v1620_v7 = vpop.xlane.xlu0 %1619 }
 0xbd8   :  { %v1622_v11 = vmul.f32 0.03125, %v1620_v7  ;;  %v1617_v12 = vpop.xlane.xlu1 %1616 }
 0xbd9   :  { %v1621_v13 = vmul.f32 0.03125, %v1617_v12 }
 0xbda   :  { %v1624_v14 = vadd.f32 1e-12, %v1622_v11 }
 0xbdb   :  { %v1623_v15 = vadd.f32 1e-12, %v1621_v13 }
 0xbdc   :  { %4742 = vrsqrt.f32 %v1624_v14 }
 0xbdd   :  { %4744 = vrsqrt.f32 %v1623_v15 }
 0xbe6   :  { %v4743_v16 = vpop.eup %4742 }
 0xbe7   :  { %v4745_v18 = vpop.eup %4744  ;;  %v1628_v19 = vmul.f32 %v4743_v16, %v1612_v63 }
 0xbe8   :  { %v1627_v20 = vmul.f32 %v4745_v18, %v1611_v0 }
 0xbe9   :  { %v1636_v22 = vmul.f32 %v3773_v17, %v1628_v19  ;;  %v1898_v19 = vld [vmem:[%s5089_s7] sm:$0xff] }
 0xbea   :  { %v1635_v23 = vmul.f32 %v3773_v17, %v1627_v20  ;;  %v1899_v20 = vld [vmem:[%s5089_s7 + $0x8] sm:$0xff] }
 0xbeb   :  { %v1644_v25 = vadd.f32 %v3774_v21, %v1636_v22  ;;  %v3794_v22 = vld [vmem:[%s5089_s7 + $0x80] sm:$0xff] }
 0xbec   :  { %v5065_v24 = vadd.f32 %v3774_v21, %v1635_v23  ;;  %v4529_v21 = vpack.c.bf16 %v1899_v20, %v1898_v19  ;;  %v3795_v23 = vld [vmem:[%s5089_s7 + $0x88] sm:$0xff]  ;;  %v3827_v19 = vld [vmem:[%s5089_s7 + $0xb8] sm:$0xff] }
 0xbee   :  { %4201 = vmatprep.mubr.msk.f32.mxu1 %vm208_vm5, %v5065_v24  ;;  %4530 = vmatprep.subr.bf16.mxu1 %v4529_v21 }
 0xbef   :  { %4202 = vmatmul.mubr.msk.f32.vlgmr.msra.gmra.mrb[14].mxu1 %vm208_vm5, %v1644_v25 }
 0xbf0   :  { %4532 = vmatpush3.bf16.msra.mxu1 %v4529_v21 }
 0xcc2   :  { %v4203_v41 = vpop.f32.mrb[14].mxu1 }
 0xcc3   :  { %v1734_v42 = vadd.f32 %v4203_v41, %v3775_v40  ;;  %v1728_v43 = vpop.f32.mrb[15].mxu1 }
 0xcc4   :  { %v1729_v44 = vadd.f32 %v3775_v40, %v1728_v43  ;;  %v3781_v43 = vld [vmem:[%s3678_s11] ss:$0 sm:$0xff]  ;;  %s3694_s11 = sld [smem:[%s5278_s0 + %s4828_s8]]  }
 0xcc5   :  { %v1738_v45 = vmul.f32 %v1734_v42, %v1734_v42 }
 0xcc6   :  { %v1737_v46 = vmul.f32 %v1729_v44, %v1729_v44 }
 0xcc7   :  { %v1740_v47 = vmul.f32 %v1738_v45, %v1734_v42 }
 0xcc8   :  { %v1739_v48 = vmul.f32 %v1737_v46, %v1729_v44 }
 0xcc9   :  { %v1742_v51 = vmul.f32 0.044715, %v1740_v47  ;;  %v3782_v47 = vld [vmem:[%s3679_s15] ss:$0 sm:$0xff]  ;;  %s3693_s15 = sld [smem:[%s5278_s0 + %s4829_s12]]  }
 0xcca   :  { %v1741_v52 = vmul.f32 0.044715, %v1739_v48 }
 0xccb   :  { %v1744_v53 = vadd.f32 %v1742_v51, %v1734_v42 }
 0xccc   :  { %v1743_v54 = vadd.f32 %v1741_v52, %v1729_v44  ;;  %v3788_v52 = vld [vmem:[%s5089_s7 + $0x50] sm:$0xff] }
 0xccd   :  { %v1746_v55 = vmul.f32 0.7978846, %v1744_v53  ;;  %v3789_v53 = vld [vmem:[%s5089_s7 + $0x58] sm:$0xff] }
 0xcce   :  { %v1745_v56 = vmul.f32 0.7978846, %v1743_v54 }
 0xccf   :  { %4746 = vtanh.f32 %v1746_v55 }
 0xcd0   :  { %4748 = vtanh.f32 %v1745_v56  ;;  %v4541_v56 = vpack.c.bf16 %v3789_v53, %v3788_v52  ;;  %v3816_v53 = vld [vmem:[%s5089_s7 + $0x60] sm:$0xff] }
 0xcd9   :  { %v4747_v57 = vpop.eup %4746 }
 0xcda   :  { %v4749_v58 = vpop.eup %4748  ;;  %v1750_v59 = vadd.f32 1.0, %v4747_v57  ;;  %v3799_v57 = vld [vmem:[%s5128_s19 + $0x4] ss:$0 sm:$0xff] }
 0xcdb   :  { %v1749_v60 = vadd.f32 1.0, %v4749_v58  ;;  %v3783_v58 = vld [vmem:[%s5128_s19] ss:$0 sm:$0xff] }
 0xcdc   :  { %v1752_v61 = vmul.f32 0.5, %v1750_v59 }
 0xcdd   :  { %v1751_v62 = vmul.f32 0.5, %v1749_v60 }
 0xcde   :  { %v1754_v0 = vmul.f32 %v1752_v61, %v1734_v42 }
 0xcdf   :  { %v1753_v63 = vmul.f32 %v1751_v62, %v1729_v44 }
 0xce1   :  { %4220 = vmatprep.mubr.msk.f32.mxu0 %vm1770_vm8, %v1753_v63 }
 0xce2   :  { %4221 = vmatmul.mubr.msk.f32.vlgmr.msra.gmra.mrb[10].mxu0 %vm1770_vm8, %v1754_v0 }
 0xdb5   :  { %v4222_v2 = vpop.f32.mrb[10].mxu0 }
 0xdb6   :  { %v1849_v3 = vadd.f32 %v4222_v2, %v3778_v1  ;;  %v1843_v50 = vpop.f32.mrb[11].mxu0 }
 0xdb7   :  { %v1844_v49 = vadd.f32 %v3778_v1, %v1843_v50 }
 0xdb8   :  { %v1853_v4 = vadd.f32 %v1849_v3, %v1644_v25  ;;  %v1900_v25 = vld [vmem:[%s5089_s7 + $0x10] sm:$0xff]  ;;  %v3791_v3 = vld [vmem:[%s5128_s19 + $0x2] ss:$0 sm:$0xff] }
 0xdb9   :  { %v1852_v6 = vadd.f32 %v1844_v49, %v5065_v24  ;;  %v4545_v24 = vpack.c.bf16 %v3795_v23, %v3794_v22  ;;  %v4533_v28 = vpack.c.bf16 %v1901_v27, %v1900_v25 }
 0xdba   :  { %v1859_v8 = vsel %vm208_vm5, %v1853_v4, 0.0 }
 0xdbb   :  { %1860 = vadd.xlane.f32.xlu0 %v1859_v8  ;;  %v1856_v9 = vsel %vm208_vm5, %v1852_v6, 0.0  ;;  %4546 = vmatprep.subr.bf16.mxu0 %v4545_v24  ;;  %v3809_v8 = vld [vmem:[%s5089_s7 + $0x28] sm:$0xff] }
 0xdbc   :  { %1857 = vadd.xlane.f32.xlu1 %v1856_v9  ;;  %4548 = vmatpush3.bf16.msra.mxu0 %v4545_v24 }
 0xdbd   :  { %4534 = vmatprep.subr.bf16.mxu1 %v4533_v28  ;;  %4550 = vmatprep.subr.bf16.mxu0 %v4549_v32 }
 0xdbe   :  { %4536 = vmatpush3.bf16.msra.mxu1 %v4533_v28 }
 0xdbf   :  { %4538 = vmatprep.subr.bf16.mxu1 %v4537_v35 }
 0xdc0   :  { %4552 = vmatpush3.bf16.msra.mxu0 %v4549_v32 }
 0xe48   :  { %v1861_v10 = vpop.xlane.xlu0 %1860 }
 0xe49   :  { %v1863_v7 = vmul.f32 0.03125, %v1861_v10  ;;  %v1858_v11 = vpop.xlane.xlu1 %1857 }
 0xe4a   :  { %v1862_v12 = vmul.f32 0.03125, %v1858_v11  ;;  %v3810_v11 = vld [vmem:[%s5089_s7 + $0x30] sm:$0xff] }
 0xe4b   :  { %v1865_v13 = vsub.f32 %v1853_v4, %v1863_v7 }
 0xe4c   :  { %v1864_v14 = vsub.f32 %v1852_v6, %v1862_v12  ;;  %v3808_v6 = vld [vmem:[%s5089_s7 + $0x20] sm:$0xff]  ;;  %v3811_v12 = vld [vmem:[%s5089_s7 + $0x38] sm:$0xff] }
 0xe4d   :  { %v1867_v15 = vmul.f32 %v1865_v13, %v1865_v13  ;;  %v4563_v7 = vpack.c.bf16 %v3809_v8, %v3808_v6 }
 0xe4e   :  { %v1866_v16 = vmul.f32 %v1864_v14, %v1864_v14 }
 0xe4f   :  { %v1871_v17 = vsel %vm208_vm5, %v1867_v15, 0.0  ;;  %v3824_v15 = vld [vmem:[%s5089_s7 + $0xa0] sm:$0xff] }
 0xe50   :  { %1872 = vadd.xlane.f32.xlu0 %v1871_v17  ;;  %v1868_v18 = vsel %vm208_vm5, %v1866_v16, 0.0  ;;  %v3825_v16 = vld [vmem:[%s5089_s7 + $0xa8] sm:$0xff] }
 0xe51   :  { %1869 = vadd.xlane.f32.xlu1 %v1868_v18  ;;  %v4579_v17 = vpack.c.bf16 %v3825_v16, %v3824_v15  ;;  %v3826_v18 = vld [vmem:[%s5089_s7 + $0xb0] sm:$0xff] }
 0xe52   :  { %v4583_v20 = vpack.c.bf16 %v3827_v19, %v3826_v18 }
 0xedd   :  { %v1873_v36 = vpop.xlane.xlu0 %1872 }
 0xede   :  { %v1875_v37 = vmul.f32 0.03125, %v1873_v36  ;;  %v1870_v38 = vpop.xlane.xlu1 %1869 }
 0xedf   :  { %v1874_v39 = vmul.f32 0.03125, %v1870_v38 }
 0xee0   :  { %v1877_v40 = vadd.f32 1e-12, %v1875_v37 }
 0xee1   :  { %v1876_v41 = vadd.f32 1e-12, %v1874_v39 }
 0xee2   :  { %4750 = vrsqrt.f32 %v1877_v40 }
 0xee3   :  { %4752 = vrsqrt.f32 %v1876_v41 }
 0xeec   :  { %v4751_v42 = vpop.eup %4750 }
 0xeed   :  { %v4753_v44 = vpop.eup %4752  ;;  %v1881_v45 = vmul.f32 %v4751_v42, %v1865_v13 }
 0xeee   :  { %v1880_v46 = vmul.f32 %v4753_v44, %v1864_v14  ;;  %v4567_v14 = vpack.c.bf16 %v3811_v12, %v3810_v11 }
 0xeef   :  { %v1889_v48 = vmul.f32 %v3781_v43, %v1881_v45 }
 0xef0   :  { %v1888_v51 = vmul.f32 %v3781_v43, %v1880_v46 }
 0xef1   :  { %v5111_v55 = vadd.f32 %v3782_v47, %v1889_v48 }
 0xef2   :  { %v5109_v54 = vadd.f32 %v3782_v47, %v1888_v51 }
 0xef4   :  { %4231 = vmatprep.mubr.msk.f32.mxu1 %vm208_vm5, %v5109_v54  ;;  %4253 = vmatprep.mubr.msk.f32.mxu0 %vm208_vm5, %v5109_v54 }
 0xef5   :  { %4232 = vmatmul.mubr.msk.f32.vlgmr.msra.gmra.mrb[16].mxu1 %vm208_vm5, %v5111_v55  ;;  %4254 = vmatmul.mubr.msk.f32.vlgmr.msra.gmra.mrb[12].mxu0 %vm208_vm5, %v5111_v55 }
 0xef6   :  { %4540 = vmatpush3.bf16.msra.mxu1 %v4537_v35  ;;  %4242 = vmatprep.mubr.msk.f32.mxu1 %vm208_vm5, %v5109_v54  ;;  %v3829_v35 = vld [vmem:[%s5128_s19 + $0x5] ss:$0 sm:$0xff] }
 0xef7   :  { %4542 = vmatprep.subr.bf16.mxu1 %v4541_v56 }
 0xefa   :  { %4544 = vmatpush3.bf16.msra.mxu1 %v4541_v56  ;;  %v3817_v56 = vld [vmem:[%s5089_s7 + $0x68] sm:$0xff] }
 0xefd   :  { %4243 = vmatmul.mubr.msk.f32.vlgmr.msra.gmra.mrb[18].mxu1 %vm208_vm5, %v5111_v55 }
 0xfc8   :  { %v4233_v59 = vpop.f32.mrb[16].mxu1  ;;  %v4255_v60 = vpop.f32.mrb[12].mxu0 }
 0xfc9   :  { %v2163_v61 = vadd.f32 %v4255_v60, %v3799_v57  ;;  %v1981_v62 = vpop.f32.mrb[17].mxu1  ;;  %v2157_v63 = vpop.f32.mrb[13].mxu0  ;;  %v1987_v13 = vadd.f32 %v4233_v59, %v3783_v58 }
 0xfca   :  { %v1982_v0 = vadd.f32 %v3783_v58, %v1981_v62  ;;  %v2158_v1 = vadd.f32 %v3799_v57, %v2157_v63  ;;  %v4571_v57 = vpack.c.bf16 %v3817_v56, %v3816_v53  ;;  %v3819_v62 = vld [vmem:[%s5089_s7 + $0x78] sm:$0xff] }
 0xfcc   :  { %v4559_v2 = vpack.c.bf16 %v2163_v61, %v2158_v1  ;;  %4260 = vmatprep.mubr.msk.f32.mxu1 %vm770_vm6, %v1982_v0  ;;  %v3818_v61 = vld [vmem:[%s5089_s7 + $0x70] sm:$0xff]  ;;  %s3667_s7 = sld [smem:[%s5278_s0 + %s4827_s4]]  }
 0xfce   :  { %4560 = vmatprep.subr.bf16.mxu0 %v4559_v2 }
 0xfcf   :  { %4562 = vmatpush3.bf16.msra.mxu0 %v4559_v2  ;;  %v4575_v2 = vpack.c.bf16 %v3819_v62, %v3818_v61 }
 0xfd0   :  { %v4244_v50 = vpop.f32.mrb[18].mxu1  ;;  %4572 = vmatprep.subr.bf16.mxu0 %v4571_v57 }
 0xfd1   :  { %v2075_v49 = vadd.f32 %v4244_v50, %v3791_v3  ;;  %v2069_v4 = vpop.f32.mrb[19].mxu1 }
 0xfd2   :  { %v2070_v9 = vadd.f32 %v3791_v3, %v2069_v4  ;;  %v3821_v4 = vld [vmem:[%s5128_s19 + $0x3] ss:$0 sm:$0xff]  ;;  %s3695_s19 = sld [smem:[%s5278_s0 + %s4830_s16]]  }
 0xfd4   :  { %v4553_v10 = vpack.c.bf16 %v2075_v49, %v2070_v9 }
 0xfd6   :  { %4555 = vmatprep.subr.msk.bf16.mxu1 %vm4976_vm7, %v4553_v10 }
 0xfd7   :  { %4558 = vmatpush3.bf16.xpose.msk.msra.mxu1 %vm4976_vm7, %v4553_v10 }
 0xfd8   :  { %4564 = vmatprep.subr.bf16.mxu1 %v4563_v7 }
 0xfde   :  { %4261 = vmatmul.mubr.msk.f32.vlgmr.msra.gmra.mrb[20].mxu1 %vm770_vm6, %v1987_v13 }
 0xfdf   :  { %4566 = vmatpush3.bf16.msra.mxu1 %v4563_v7  ;;  %4278 = vmatprep.mubr.msk.f32.mxu1 %vm208_vm5, %v5109_v54 }
 0xfe0   :  { %4568 = vmatprep.subr.bf16.mxu1 %v4567_v14 }
 0xfe3   :  { %4570 = vmatpush3.bf16.msra.mxu1 %v4567_v14 }
 0xfe4   :  { %4580 = vmatprep.subr.bf16.mxu1 %v4579_v17 }
 0xfe6   :  { %4279 = vmatmul.mubr.msk.f32.vlgmr.msra.gmra.mrb[22].mxu1 %vm208_vm5, %v5111_v55 }
 0xfe7   :  { %4582 = vmatpush3.bf16.msra.mxu1 %v4579_v17  ;;  %4300 = vmatprep.mubr.msk.f32.mxu1 %vm208_vm5, %v5109_v54 }
 0xfe8   :  { %4584 = vmatprep.subr.bf16.mxu1 %v4583_v20 }
 0xfeb   :  { %4586 = vmatpush3.bf16.msra.mxu1 %v4583_v20 }
 0xfee   :  { %4301 = vmatmul.mubr.msk.f32.vlgmr.msra.gmra.mrb[24].mxu1 %vm208_vm5, %v5111_v55 }
0x10b1   :  { %v4262_v21 = vpop.f32.mrb[20].mxu1 }
0x10b2   :  { %v2254_v22 = vmul.f32 0.25, %v4262_v21  ;;  %v2244_v23 = vpop.f32.mrb[21].mxu1 }
0x10b3   :  { %v2253_v24 = vmul.f32 0.25, %v2244_v23 }
0x10b4   :  { %v2256_v25 = vadd.f32 %v2254_v22, %v5005_v29 }
0x10b5   :  { %v2255_v27 = vadd.f32 %v2253_v24, %v5003_v26 }
0x10b6   :  { %v2260_v28 = vsel %vm770_vm6, %v2256_v25, -inf }
0x10b7   :  { %2261 = vmax.xlane.f32.xlu0 %v2260_v28  ;;  %v2257_v30 = vsel %vm770_vm6, %v2255_v27, -inf  ;;  %v3839_v28 = vld [vmem:[%s3682_s23 + $0x18] sm:$0xff] }
0x10b8   :  { %2258 = vmax.xlane.f32.xlu1 %v2257_v30 }
0x10b9   :  { %v4280_v32 = vpop.f32.mrb[22].mxu1 }
0x10ba   :  { %v2447_v33 = vadd.f32 %v4280_v32, %v3813_v31  ;;  %v2441_v34 = vpop.f32.mrb[23].mxu1 }
0x10bb   :  { %v2442_v3 = vadd.f32 %v3813_v31, %v2441_v34 }
0x10c1   :  { %v4302_v36 = vpop.f32.mrb[24].mxu1 }
0x10c2   :  { %v2623_v37 = vadd.f32 %v4302_v36, %v3829_v35  ;;  %v2617_v38 = vpop.f32.mrb[25].mxu1 }
0x10c3   :  { %v2618_v39 = vadd.f32 %v3829_v35, %v2617_v38  ;;  %v2361_v38 = vld [vmem:[%s3682_s23 + $0x8] sm:$0xff] }
0x10c5   :  { %v4593_v40 = vpack.c.bf16 %v2623_v37, %v2618_v39  ;;  %v2360_v37 = vld [vmem:[%s3682_s23] sm:$0xff] }
0x10c6   :  { %v4601_v39 = vpack.c.bf16 %v2361_v38, %v2360_v37 }
0x10c7   :  { %4594 = vmatprep.subr.bf16.mxu1 %v4593_v40 }
0x10c8   :  { %4596 = vmatpush3.bf16.msra.mxu1 %v4593_v40 }
0x1144   :  { %v2262_v41 = vpop.xlane.xlu0 %2261 }
0x1145   :  { %v2264_v42 = vsub.f32 %v2256_v25, %v2262_v41  ;;  %v2259_v43 = vpop.xlane.xlu1 %2258 }
0x1146   :  { %v2263_v44 = vsub.f32 %v2255_v27, %v2259_v43  ;;  %v3838_v27 = vld [vmem:[%s3682_s23 + $0x10] sm:$0xff]  ;;  %s3698_s23 = sld [smem:[%s5278_s0 + %s4831_s20]]  }
0x1147   :  { %v2267_v45 = vmul.f32 1.442695, %v2264_v42  ;;  %v4597_v30 = vpack.c.bf16 %v3839_v28, %v3838_v27  ;;  %v3844_v42 = vld [vmem:[%s3683_s27] ss:$0 sm:$0xff]  ;;  %v3156_v27 = vld [vmem:[%s3688_s13 + $0x30] sm:$0xff]  ;;  %v3157_v28 = vld [vmem:[%s3688_s13 + $0x38] sm:$0xff]  ;;  %s3699_s27 = sld [smem:[%s5278_s0 + %s4832_s24]]  }
0x1148   :  { %v2265_v46 = vmul.f32 1.442695, %v2263_v44 }
0x1149   :  { %4754 = vpow2.f32 %v2267_v45 }
0x114a   :  { %4756 = vpow2.f32 %v2265_v46 }
0x1153   :  { %v4755_v47 = vpop.eup %4754 }
0x1154   :  { %v4757_v48 = vpop.eup %4756  ;;  %v2272_v51 = vsel %vm770_vm6, %v4755_v47, 0.0 }
0x1155   :  { %2273 = vadd.xlane.f32.xlu0 %v2272_v51  ;;  %v2269_v52 = vsel %vm770_vm6, %v4757_v48, 0.0 }
0x1156   :  { %2270 = vadd.xlane.f32.xlu1 %v2269_v52 }
0x11e2   :  { %v2274_v58 = vpop.xlane.xlu0 %2273 }
0x11e3   :  { %4758 = vrcp.f32 %v2274_v58  ;;  %v2271_v59 = vpop.xlane.xlu1 %2270 }
0x11e4   :  { %4760 = vrcp.f32 %v2271_v59 }
0x11ed   :  { %v4759_v60 = vpop.eup %4758 }
0x11ee   :  { %v4761_v63 = vpop.eup %4760  ;;  %v2278_v1 = vmul.f32 %v4759_v60, %v4755_v47 }
0x11ef   :  { %v2277_v0 = vmul.f32 %v4761_v63, %v4757_v48 }
0x11f1   :  { %4267 = vmatprep.mubr.msk.f32.mxu0 %vm770_vm6, %v2277_v0  ;;  %v3041_v0 = vld [vmem:[%s3686_s1 + $0x8] sm:$0xff] }
0x11f2   :  { %4268 = vmatmul.mubr.msk.f32.vlgmr.msra.gmra.mrb[14].mxu0 %vm770_vm6, %v2278_v1 }
0x11f3   :  { %4574 = vmatpush3.bf16.msra.mxu0 %v4571_v57  ;;  %4289 = vmatprep.mubr.msk.f32.mxu0 %vm208_vm5, %v5109_v54 }
0x11f4   :  { %4576 = vmatprep.subr.bf16.mxu0 %v4575_v2 }
0x11f7   :  { %4578 = vmatpush3.bf16.msra.mxu0 %v4575_v2  ;;  %v3042_v2 = vld [vmem:[%s3686_s1 + $0x10] sm:$0xff] }
0x11fa   :  { %4290 = vmatmul.mubr.msk.f32.vlgmr.msra.gmra.mrb[16].mxu0 %vm208_vm5, %v5111_v55 }
0x11fb   :  { %4307 = vmatprep.mubr.msk.f32.mxu0 %vm770_vm6, %v2442_v3  ;;  %v3043_v3 = vld [vmem:[%s3686_s1 + $0x18] sm:$0xff] }
0x12c5   :  { %v4269_v50 = vpop.f32.mrb[14].mxu0 }
0x12c6   :  { %v2351_v49 = vpop.f32.mrb[15].mxu0 }
0x12cd   :  { %v4291_v6 = vpop.f32.mrb[16].mxu0 }
0x12ce   :  { %v2535_v8 = vadd.f32 %v4291_v6, %v3821_v4  ;;  %v2529_v9 = vpop.f32.mrb[17].mxu0 }
0x12cf   :  { %v2530_v10 = vadd.f32 %v3821_v4, %v2529_v9 }
0x12d1   :  { %v4587_v7 = vpack.c.bf16 %v2535_v8, %v2530_v10 }
0x12d3   :  { %4589 = vmatprep.subr.msk.bf16.mxu0 %vm4976_vm7, %v4587_v7 }
0x12d4   :  { %4592 = vmatpush3.bf16.xpose.msk.msra.mxu0 %vm4976_vm7, %v4587_v7 }
0x12d5   :  { %4598 = vmatprep.subr.bf16.mxu0 %v4597_v30 }
0x12db   :  { %4308 = vmatmul.mubr.msk.f32.vlgmr.msra.gmra.mrb[18].mxu0 %vm770_vm6, %v2447_v33 }
0x12dc   :  { %4600 = vmatpush3.bf16.msra.mxu0 %v4597_v30  ;;  %v4625_v30 = vpack.c.bf16 %v3157_v28, %v3156_v27  ;;  %v3367_v27 = vld [vmem:[%s3692_s3 + $0x8] sm:$0xff] }
0x12dd   :  { %4602 = vmatprep.subr.bf16.mxu0 %v4601_v39 }
0x13ae   :  { %v4309_v11 = vpop.f32.mrb[18].mxu0 }
0x13af   :  { %v2714_v12 = vmul.f32 0.25, %v4309_v11  ;;  %v2704_v13 = vpop.f32.mrb[19].mxu0  ;;  %v3845_v11 = vld [vmem:[%s3684_s5] ss:$0 sm:$0xff]  ;;  %s3697_s5 = sld [smem:[%s5278_s0 + %s4834_s2]]  }
0x13b0   :  { %v2713_v14 = vmul.f32 0.25, %v2704_v13 }
0x13b1   :  { %v2716_v15 = vadd.f32 %v2714_v12, %v5005_v29 }
0x13b2   :  { %v2715_v16 = vadd.f32 %v2713_v14, %v5003_v26 }
0x13b3   :  { %v2720_v17 = vsel %vm770_vm6, %v2716_v15, -inf }
0x13b4   :  { %2721 = vmax.xlane.f32.xlu0 %v2720_v17  ;;  %v2717_v18 = vsel %vm770_vm6, %v2715_v16, -inf }
0x13b5   :  { %2718 = vmax.xlane.f32.xlu1 %v2717_v18 }
0x1441   :  { %v2722_v19 = vpop.xlane.xlu0 %2721 }
0x1442   :  { %v2724_v20 = vsub.f32 %v2716_v15, %v2722_v19  ;;  %v2719_v5 = vpop.xlane.xlu1 %2718  ;;  %v3846_v15 = vld [vmem:[%s3685_s9] ss:$0 sm:$0xff]  ;;  %s3700_s9 = sld [smem:[%s5278_s0 + %s4835_s6]]  }
0x1443   :  { %v2723_v21 = vsub.f32 %v2715_v16, %v2719_v5  ;;  %v3151_v5 = vld [vmem:[%s3688_s13 + $0x8] sm:$0xff] }
0x1444   :  { %v2727_v22 = vmul.f32 1.442695, %v2724_v20  ;;  %v3150_v20 = vld [vmem:[%s3688_s13] sm:$0xff] }
0x1445   :  { %v2725_v23 = vmul.f32 1.442695, %v2723_v21  ;;  %v4613_v21 = vpack.c.bf16 %v3151_v5, %v3150_v20 }
0x1446   :  { %4762 = vpow2.f32 %v2727_v22  ;;  %v3152_v22 = vld [vmem:[%s3688_s13 + $0x10] sm:$0xff] }
0x1447   :  { %4764 = vpow2.f32 %v2725_v23  ;;  %v3153_v23 = vld [vmem:[%s3688_s13 + $0x18] sm:$0xff] }
0x1450   :  { %v4763_v24 = vpop.eup %4762 }
0x1451   :  { %v4765_v25 = vpop.eup %4764  ;;  %v2732_v29 = vsel %vm770_vm6, %v4763_v24, 0.0 }
0x1452   :  { %2733 = vadd.xlane.f32.xlu0 %v2732_v29  ;;  %v2729_v26 = vsel %vm770_vm6, %v4765_v25, 0.0  ;;  %v3155_v29 = vld [vmem:[%s3688_s13 + $0x28] sm:$0xff] }
0x1453   :  { %2730 = vadd.xlane.f32.xlu1 %v2729_v26 }
0x14df   :  { %v2734_v31 = vpop.xlane.xlu0 %2733 }
0x14e0   :  { %4766 = vrcp.f32 %v2734_v31  ;;  %v2731_v32 = vpop.xlane.xlu1 %2730  ;;  %v3847_v31 = vld [vmem:[%s3687_s17] ss:$0 sm:$0xff] }
0x14e1   :  { %4768 = vrcp.f32 %v2731_v32 }
0x14ea   :  { %v4767_v33 = vpop.eup %4766 }
0x14eb   :  { %v4769_v34 = vpop.eup %4768  ;;  %v2738_v36 = vmul.f32 %v4767_v33, %v4763_v24  ;;  %v4617_v24 = vpack.c.bf16 %v3153_v23, %v3152_v22  ;;  %v3854_v22 = vld [vmem:[%s3691_s29] ss:$0 sm:$0xff] }
0x14ec   :  { %v2737_v35 = vmul.f32 %v4769_v34, %v4765_v25  ;;  %v3154_v25 = vld [vmem:[%s3688_s13 + $0x20] sm:$0xff] }
0x14ed   :  { %v4621_v26 = vpack.c.bf16 %v3155_v29, %v3154_v25 }
0x14ee   :  { %4314 = vmatprep.mubr.msk.f32.mxu1 %vm770_vm6, %v2737_v35 }
0x14ef   :  { %4315 = vmatmul.mubr.msk.f32.vlgmr.msra.gmra.mrb[26].mxu1 %vm770_vm6, %v2738_v36 }
0x15c2   :  { %v4316_v40 = vpop.f32.mrb[26].mxu1 }
0x15c3   :  { %v2811_v41 = vpop.f32.mrb[27].mxu1 }
0x15c4   :  { %4321 = vmatprep.mubr.msk.f32.mxu0 %vm770_vm6, %v2811_v41 }
0x15c5   :  { %4322 = vmatmul.mubr.msk.f32.vlgmr.msra.gmra.mrb[20].mxu0 %vm770_vm6, %v4316_v40 }
0x15c6   :  { %4604 = vmatpush3.bf16.msra.mxu0 %v4601_v39  ;;  %4328 = vmatprep.mubr.msk.f32.mxu0 %vm770_vm6, %v2351_v49 }
0x15c7   :  { %4614 = vmatprep.subr.bf16.mxu0 %v4613_v21 }
0x15cd   :  { %4329 = vmatmul.mubr.msk.f32.vlgmr.msra.gmra.mrb[20].mxu0 %vm770_vm6, %v4269_v50  ;;  %v4609_v50 = vpack.c.bf16 %v3043_v3, %v3042_v2 }
0x15ce   :  { %4616 = vmatpush3.bf16.msra.mxu0 %v4613_v21 }
0x15cf   :  { %4618 = vmatprep.subr.bf16.mxu0 %v4617_v24 }
0x15d2   :  { %4620 = vmatpush3.bf16.msra.mxu0 %v4617_v24 }
0x15d3   :  { %4622 = vmatprep.subr.bf16.mxu0 %v4621_v26 }
0x15d6   :  { %4624 = vmatpush3.bf16.msra.mxu0 %v4621_v26  ;;  %v3366_v26 = vld [vmem:[%s3692_s3] sm:$0xff] }
0x15d7   :  { %4626 = vmatprep.subr.bf16.mxu0 %v4625_v30 }
0x15da   :  { %4628 = vmatpush3.bf16.msra.mxu0 %v4625_v30  ;;  %v3292_v30 = vld [vmem:[%s3667_s7] sm:$0x3] }
0x16a0   :  { %v4330_v43 = vpop.f32.mrb[20].mxu0 }
0x16a1   :  { %v2993_v44 = vadd.f32 %v4330_v43, %v3844_v42  ;;  %v2976_v45 = vpop.f32.mrb[21].mxu0 }
0x16a2   :  { %v2992_v46 = vadd.f32 %v3844_v42, %v2976_v45 }
0x16a3   :  { %v2995_v47 = vadd.f32 %v2993_v44, %v5111_v55 }
0x16a4   :  { %v2994_v48 = vadd.f32 %v2992_v46, %v5109_v54  ;;  %v3040_v54 = vld [vmem:[%s3686_s1] sm:$0xff]  ;;  %s3696_s1 = sld [smem:[%s5278_s0 + %s4833_s28]]  }
0x16a5   :  { %v3001_v51 = vsel %vm208_vm5, %v2995_v47, 0.0  ;;  %v4605_v1 = vpack.c.bf16 %v3041_v0, %v3040_v54 }
0x16a6   :  { %3002 = vadd.xlane.f32.xlu0 %v3001_v51  ;;  %v2998_v52 = vsel %vm208_vm5, %v2994_v48, 0.0 }
0x16a7   :  { %2999 = vadd.xlane.f32.xlu1 %v2998_v52  ;;  %4606 = vmatprep.subr.bf16.mxu1 %v4605_v1 }
0x16a8   :  { %4608 = vmatpush3.bf16.msra.mxu1 %v4605_v1 }
0x16a9   :  { %4610 = vmatprep.subr.bf16.mxu1 %v4609_v50 }
0x16ac   :  { %4612 = vmatpush3.bf16.msra.mxu1 %v4609_v50 }
0x1733   :  { %v3003_v53 = vpop.xlane.xlu0 %3002 }
0x1734   :  { %v3005_v56 = vmul.f32 0.03125, %v3003_v53  ;;  %v3000_v57 = vpop.xlane.xlu1 %2999 }
0x1735   :  { %v3004_v58 = vmul.f32 0.03125, %v3000_v57 }
0x1736   :  { %v3007_v59 = vsub.f32 %v2995_v47, %v3005_v56 }
0x1737   :  { %v3006_v60 = vsub.f32 %v2994_v48, %v3004_v58  ;;  %v3850_v58 = vld [vmem:[%s3689_s21] ss:$0 sm:$0xff] }
0x1738   :  { %v3009_v61 = vmul.f32 %v3007_v59, %v3007_v59 }
0x1739   :  { %v3008_v62 = vmul.f32 %v3006_v60, %v3006_v60 }
0x173a   :  { %v3013_v63 = vsel %vm208_vm5, %v3009_v61, 0.0 }
0x173b   :  { %3014 = vadd.xlane.f32.xlu0 %v3013_v63  ;;  %v3010_v55 = vsel %vm208_vm5, %v3008_v62, 0.0 }
0x173c   :  { %3011 = vadd.xlane.f32.xlu1 %v3010_v55 }
0x17c8   :  { %v3015_v49 = vpop.xlane.xlu0 %3014 }
0x17c9   :  { %v3017_v4 = vmul.f32 0.03125, %v3015_v49  ;;  %v3012_v6 = vpop.xlane.xlu1 %3011 }
0x17ca   :  { %v3016_v8 = vmul.f32 0.03125, %v3012_v6 }
0x17cb   :  { %v3019_v9 = vadd.f32 1e-12, %v3017_v4 }
0x17cc   :  { %v3018_v10 = vadd.f32 1e-12, %v3016_v8 }
0x17cd   :  { %4770 = vrsqrt.f32 %v3019_v9 }
0x17ce   :  { %4772 = vrsqrt.f32 %v3018_v10 }
0x17d7   :  { %v4771_v7 = vpop.eup %4770 }
0x17d8   :  { %v4773_v12 = vpop.eup %4772  ;;  %v3023_v13 = vmul.f32 %v4771_v7, %v3007_v59  ;;  %v4821_v7 = vmov 0.0|0.0  }
0x17d9   :  { %v3022_v14 = vmul.f32 %v4773_v12, %v3006_v60  ;;  %4629 = vmatprep.subr.bf16.mxu1 %v4821_v7  ;;  %4644 = vmatprep.subr.bf16.mxu0 %v4821_v7 }
0x17da   :  { %v3031_v16 = vmul.f32 %v3845_v11, %v3023_v13 }
0x17db   :  { %v3030_v17 = vmul.f32 %v3845_v11, %v3022_v14  ;;  %v4823_v11 = vmov 0.0  }
0x17dc   :  { %v3039_v19 = vadd.f32 %v3846_v15, %v3031_v16 }
0x17dd   :  { %v5213_v18 = vadd.f32 %v3846_v15, %v3030_v17 }
0x17df   :  { %4339 = vmatprep.mubr.msk.f32.mxu1 %vm208_vm5, %v5213_v18 }
0x17e0   :  { %4340 = vmatmul.mubr.msk.f32.vlgmr.msra.gmra.mrb[28].mxu1 %vm208_vm5, %v3039_v19 }
0x17e1   :  { %4365 = vmatprep.mubr.msk.f32.mxu1 %vm4822_vm9, %v4823_v11 }
0x18b3   :  { %v4341_v32 = vpop.f32.mrb[28].mxu1 }
0x18b4   :  { %v3129_v33 = vadd.f32 %v4341_v32, %v3847_v31  ;;  %v3123_v34 = vpop.f32.mrb[29].mxu1  ;;  %v3368_v32 = vld [vmem:[%s3692_s3 + $0x10] sm:$0xff] }
0x18b5   :  { %v3124_v35 = vadd.f32 %v3847_v31, %v3123_v34  ;;  %v4633_v31 = vpack.c.bf16 %v3367_v27, %v3366_v26 }
0x18b6   :  { %v3133_v36 = vmul.f32 %v3129_v33, %v3129_v33 }
0x18b7   :  { %v3132_v37 = vmul.f32 %v3124_v35, %v3124_v35 }
0x18b8   :  { %v3135_v38 = vmul.f32 %v3133_v36, %v3129_v33 }
0x18b9   :  { %v3134_v39 = vmul.f32 %v3132_v37, %v3124_v35  ;;  %v3451_v37 = vld [vmem:[%s3694_s11] sm:$0xff] }
0x18ba   :  { %v3137_v40 = vmul.f32 0.044715, %v3135_v38  ;;  %v3452_v38 = vld [vmem:[%s3694_s11 + $0x8] sm:$0xff] }
0x18bb   :  { %v3136_v41 = vmul.f32 0.044715, %v3134_v39  ;;  %v3453_v39 = vld [vmem:[%s3694_s11 + $0x10] sm:$0xff] }
0x18bc   :  { %v3139_v42 = vadd.f32 %v3137_v40, %v3129_v33  ;;  %v4639_v40 = vpack.c.bf16 %v3452_v38, %v3451_v37 }
0x18bd   :  { %v3138_v43 = vadd.f32 %v3136_v41, %v3124_v35  ;;  %v3454_v41 = vld [vmem:[%s3694_s11 + $0x18] sm:$0xff] }
0x18be   :  { %v3141_v44 = vmul.f32 0.7978846, %v3139_v42  ;;  %v4642_v42 = vpack.c.bf16 %v3454_v41, %v3453_v39 }
0x18bf   :  { %v3140_v45 = vmul.f32 0.7978846, %v3138_v43  ;;  %v3856_v43 = vld [vmem:[%s3693_s15] ss:$0 sm:$0xff] }
0x18c0   :  { %4774 = vtanh.f32 %v3141_v44 }
0x18c1   :  { %4776 = vtanh.f32 %v3140_v45 }
0x18ca   :  { %v4775_v46 = vpop.eup %4774 }
0x18cb   :  { %v4777_v47 = vpop.eup %4776  ;;  %v3145_v48 = vadd.f32 1.0, %v4775_v46 }
0x18cc   :  { %v3144_v51 = vadd.f32 1.0, %v4777_v47 }
0x18cd   :  { %v3147_v52 = vmul.f32 0.5, %v3145_v48  ;;  %v3858_v48 = vld [vmem:[%s3695_s19] ss:$0 sm:$0xff] }
0x18ce   :  { %v3146_v53 = vmul.f32 0.5, %v3144_v51 }
0x18cf   :  { %v3149_v57 = vmul.f32 %v3147_v52, %v3129_v33  ;;  %v3369_v33 = vld [vmem:[%s3692_s3 + $0x18] sm:$0xff] }
0x18d0   :  { %v3148_v56 = vmul.f32 %v3146_v53, %v3124_v35  ;;  %v4636_v34 = vpack.c.bf16 %v3369_v33, %v3368_v32 }
0x18d2   :  { %4358 = vmatprep.mubr.msk.f32.mxu0 %vm1770_vm8, %v3148_v56 }
0x18d3   :  { %4359 = vmatmul.mubr.msk.f32.vlgmr.msra.gmra.mrb[22].mxu0 %vm1770_vm8, %v3149_v57 }
0x18d4   :  { %4394 = vmatprep.mubr.msk.f32.mxu0 %vm4822_vm9, %v4823_v11 }
0x19a6   :  { %v4360_v59 = vpop.f32.mrb[22].mxu0 }
0x19a7   :  { %v3243_v60 = vadd.f32 %v4360_v59, %v3850_v58  ;;  %v3237_v61 = vpop.f32.mrb[23].mxu0 }
0x19a8   :  { %v3238_v62 = vadd.f32 %v3850_v58, %v3237_v61 }
0x19a9   :  { %v3247_v63 = vadd.f32 %v3243_v60, %v3039_v19  ;;  %v3853_v19 = vld [vmem:[%s3690_s25] ss:$0 sm:$0xff] }
0x19aa   :  { %v3246_v55 = vadd.f32 %v3238_v62, %v5213_v18  ;;  %v3567_v62 = vld [vmem:[%s3698_s23] sm:$0xff] }
0x19ab   :  { %v3253_v54 = vsel %vm208_vm5, %v3247_v63, 0.0 }
0x19ac   :  { %3254 = vadd.xlane.f32.xlu0 %v3253_v54  ;;  %v3250_v0 = vsel %vm208_vm5, %v3246_v55, 0.0  ;;  %v98_v54 = vstv %s3699_s27 }
0x19ad   :  { %3251 = vadd.xlane.f32.xlu1 %v3250_v0  ;;  %99 = vst [vmem:[#allocation2] sm:$0x1] %v98_v54 }
0x1a39   :  { %v3255_v1 = vpop.xlane.xlu0 %3254 }
0x1a3a   :  { %v3257_v2 = vmul.f32 0.03125, %v3255_v1  ;;  %v3252_v3 = vpop.xlane.xlu1 %3251 }
0x1a3b   :  { %v3256_v50 = vmul.f32 0.03125, %v3252_v3 }
0x1a3c   :  { %v3259_v49 = vsub.f32 %v3247_v63, %v3257_v2  ;;  %v3568_v63 = vld [vmem:[%s3698_s23 + $0x8] sm:$0xff] }
0x1a3d   :  { %v3258_v4 = vsub.f32 %v3246_v55, %v3256_v50  ;;  %v4645_v55 = vpack.c.bf16 %v3568_v63, %v3567_v62  ;;  %v3860_v50 = vld [vmem:[%s3696_s1] ss:$0 sm:$0xff] }
0x1a3e   :  { %v3261_v6 = vmul.f32 %v3259_v49, %v3259_v49 }
0x1a3f   :  { %v3260_v8 = vmul.f32 %v3258_v4, %v3258_v4  ;;  %4646 = vmatpush3.bf16.msra.mxu0 %v4645_v55 }
0x1a40   :  { %v3265_v9 = vsel %vm208_vm5, %v3261_v6, 0.0 }
0x1a41   :  { %3266 = vadd.xlane.f32.xlu0 %v3265_v9  ;;  %v3262_v10 = vsel %vm208_vm5, %v3260_v8, 0.0 }
0x1a42   :  { %3263 = vadd.xlane.f32.xlu1 %v3262_v10  ;;  %v3862_v10 = vld [vmem:[#allocation2] ss:$0 sm:$0xff] }
0x1ace   :  { %v3267_v12 = vpop.xlane.xlu0 %3266 }
0x1acf   :  { %v3269_v13 = vmul.f32 0.03125, %v3267_v12  ;;  %v3264_v14 = vpop.xlane.xlu1 %3263 }
0x1ad0   :  { %v3268_v15 = vmul.f32 0.03125, %v3264_v14 }
0x1ad1   :  { %v3271_v16 = vadd.f32 1e-12, %v3269_v13 }
0x1ad2   :  { %v3270_v17 = vadd.f32 1e-12, %v3268_v15 }
0x1ad3   :  { %4778 = vrsqrt.f32 %v3271_v16 }
0x1ad4   :  { %4780 = vrsqrt.f32 %v3270_v17 }
0x1add   :  { %v4779_v18 = vpop.eup %4778 }
0x1ade   :  { %v4781_v20 = vpop.eup %4780  ;;  %v3275_v5 = vmul.f32 %v4779_v18, %v3259_v49 }
0x1adf   :  { %v3274_v21 = vmul.f32 %v4781_v20, %v3258_v4  ;;  %v3861_v4 = vld [vmem:[%s3697_s5] ss:$0 sm:$0xff] }
0x1ae0   :  { %v3283_v23 = vmul.f32 %v3853_v19, %v3275_v5 }
0x1ae1   :  { %v3282_v24 = vmul.f32 %v3853_v19, %v3274_v21 }
0x1ae2   :  { %v3291_v25 = vadd.f32 %v3854_v22, %v3283_v23 }
0x1ae3   :  { %v3290_v29 = vadd.f32 %v3854_v22, %v3282_v24 }
0x1ae5   :  { %v4630_v28 = vpack.c.bf16 %v3291_v25, %v3290_v29 }
0x1ae7   :  { %4631 = vmatpush3.bf16.msra.mxu1 %v4630_v28 }
0x1ae8   :  { %4632 = vmatprep.subr.bf16.mxu1 %v4821_v7 }
0x1aea   :  { %4366 = vmatmul.mubr.msk.f32.vlgmr.msra.gmra.mrb[30].mxu1 %vm770_vm6, %v3292_v30 }
0x1aeb   :  { %4634 = vmatpush3.bf16.msra.mxu1 %v4633_v31  ;;  %4376 = vmatprep.mubr.msk.f32.mxu1 %vm4822_vm9, %v4823_v11 }
0x1aec   :  { %4635 = vmatprep.subr.bf16.mxu1 %v4821_v7 }
0x1aef   :  { %4637 = vmatpush3.bf16.msra.mxu1 %v4636_v34 }
0x1af0   :  { %4638 = vmatprep.subr.bf16.mxu1 %v4821_v7 }
0x1bbd   :  { %v3362_v35 = vpop.f32.mrb[30].mxu1 }
0x1bbe   :  { %v4367_v36 = vpop.f32.mrb[31].mxu1  ;;  %4377 = vmatmul.mubr.msk.f32.vlgmr.msra.gmra.mrb[32].mxu1 %vm208_vm5, %v3362_v35 }
0x1bbf   :  { %4387 = vmatprep.mubr.msk.f32.mxu1 %vm4822_vm9, %v4823_v11  ;;  %4640 = vmatpush3.bf16.msra.mxu1 %v4639_v40 }
0x1bc0   :  { %4641 = vmatprep.subr.bf16.mxu1 %v4821_v7 }
0x1bc3   :  { %4643 = vmatpush3.bf16.msra.mxu1 %v4642_v42 }
0x1c91   :  { %v3446_v44 = vpop.f32.mrb[32].mxu1 }
0x1c92   :  { %v3447_v45 = vadd.f32 %v3856_v43, %v3446_v44  ;;  %v4378_v46 = vpop.f32.mrb[33].mxu1 }
0x1c94   :  { %4782 = vtanh.f32 %v3447_v45 }
0x1c9e   :  { %v4783_v47 = vpop.eup %4782 }
0x1c9f   :  { %4388 = vmatmul.mubr.msk.f32.vlgmr.msra.gmra.mrb[34].mxu1 %vm208_vm5, %v4783_v47 }
0x1d72   :  { %v3531_v51 = vpop.f32.mrb[34].mxu1 }
0x1d73   :  { %v3532_v52 = vadd.f32 %v3858_v48, %v3531_v51  ;;  %v4389_v53 = vpop.f32.mrb[35].mxu1 }
0x1d75   :  { %v3538_v56 = vsel %vm3537_vm10, %v3532_v52, 0.0 }
0x1d76   :  { %3539 = vadd.xlane.f32.xlu1 %v3538_v56 }
0x1e03   :  { %v3540_v57 = vpop.xlane.xlu1 %3539 }
0x1e04   :  { %v3542_v58 = vmul.f32 0.0625, %v3540_v57 }
0x1e06   :  { %v3543_v59 = vsub.f32 %v3532_v52, %v3542_v58 }
0x1e08   :  { %v3544_v60 = vmul.f32 %v3543_v59, %v3543_v59 }
0x1e0a   :  { %v3545_v61 = vsel %vm3537_vm10, %v3544_v60, 0.0 }
0x1e0b   :  { %3546 = vadd.xlane.f32.xlu0 %v3545_v61 }
0x1e98   :  { %v3547_v0 = vpop.xlane.xlu0 %3546 }
0x1e99   :  { %v3548_v1 = vmul.f32 0.0625, %v3547_v0 }
0x1e9b   :  { %v3549_v2 = vadd.f32 1e-05, %v3548_v1 }
0x1e9d   :  { %4784 = vrsqrt.f32 %v3549_v2 }
0x1ea7   :  { %v4785_v3 = vpop.eup %4784 }
0x1ea8   :  { %v3551_v49 = vmul.f32 %v4785_v3, %v3543_v59 }
0x1eaa   :  { %v3558_v6 = vmul.f32 %v3860_v50, %v3551_v49 }
0x1eac   :  { %v3565_v8 = vadd.f32 %v3861_v4, %v3558_v6 }
0x1eae   :  { %v3566_v9 = vmax.f32 %v3565_v8, 0.0 }
0x1eb0   :  { %4395 = vmatmul.mubr.msk.f32.vlgmr.msra.gmra.mrb[24].mxu0 %vm770_vm6, %v3566_v9 }
0x1f83   :  { %v3645_v7 = vpop.f32.mrb[24].mxu0 }
0x1f84   :  { %v3646_v11 = vadd.f32 %v3862_v10, %v3645_v7  ;;  %v4396_v12 = vpop.f32.mrb[25].mxu0 }
0x1f86   :  { %3650 = vst.msk [vmem:[%s3700_s9] sm:$0x3] %vm3649_vm11, %v3646_v11 }

</bundles_post_ra>
